<compile_context>
chip_gen: v6e
topology: v6e:2x2x1
jax: 0.10.0
libtpu: 0.0.40
codegen_flags: <defaults>
</compile_context>

<pallas_src>
import functools

import jax
import jax.numpy as jnp
from jax.experimental import pallas as pl
from jax.experimental.pallas import tpu as pltpu


# ----------------------------------------------------------------------------
# Kernels
# ----------------------------------------------------------------------------

def se_kernel(x_ref, w1t_ref, b1_ref, w2t_ref, b2_ref, o_ref, *, inv_hw):
    """Single-pass SE: pool + fc1/ReLU + fc2/sigmoid + scale on one batch tile."""
    x = x_ref[...]                                                # (Bt, C, HWp)
    # f32 accumulation only for the pooled mean; the big tile stays in the
    # streaming dtype (no full-tile f32 copy).
    pooled = jnp.sum(x, axis=-1, dtype=jnp.float32) * inv_hw      # (Bt, C) f32
    h = jnp.dot(pooled, w1t_ref[...],
                preferred_element_type=jnp.float32) + b1_ref[...]  # (Bt, Cr)
    h = jnp.maximum(h, 0.0)
    s = jnp.dot(h, w2t_ref[...],
                preferred_element_type=jnp.float32) + b2_ref[...]  # (Bt, C)
    s = jax.nn.sigmoid(s)
    # Final scale in the streaming dtype (exact for f32 inputs).
    o_ref[...] = x * s.astype(x.dtype)[:, :, None]


def pool_kernel(x_ref, pooled_ref, *, inv_hw):
    """Two-pass fallback, pass A: accumulate the per-(n,c) mean over HW tiles."""
    t = pl.program_id(1)

    @pl.when(t == 0)
    def _():
        pooled_ref[...] = jnp.zeros_like(pooled_ref)

    part = jnp.sum(x_ref[...], axis=-1, dtype=jnp.float32)        # (Bt, C)
    pooled_ref[...] += part[:, None, :]                           # (Bt, 1, C)

    @pl.when(t == pl.num_programs(1) - 1)
    def _():
        pooled_ref[...] = pooled_ref[...] * inv_hw


def scale_kernel(pooled_ref, w1t_ref, b1_ref, w2t_ref, b2_ref, x_ref, o_ref,
                 *, bt):
    """Two-pass fallback, pass B: per-tile FC + sigmoid + scale.

    The FC work is O(Bt*C*Cr) and negligible, so recomputing it per HW tile is
    free relative to streaming the tile.
    """
    n = pl.program_id(0)
    row = pl.multiple_of(n * bt, bt)
    pooled = pooled_ref[pl.ds(row, bt)][:, 0, :]                  # (Bt, C) f32
    h = jnp.dot(pooled, w1t_ref[...],
                preferred_element_type=jnp.float32) + b1_ref[...]
    h = jnp.maximum(h, 0.0)
    s = jax.nn.sigmoid(
        jnp.dot(h, w2t_ref[...],
                preferred_element_type=jnp.float32) + b2_ref[...])
    x = x_ref[...]
    o_ref[...] = x * s.astype(x.dtype)[:, :, None]


# ----------------------------------------------------------------------------
# Tiling heuristics
# ----------------------------------------------------------------------------

def _chip_params():
    """(target block bytes, TensorCores per chip, safe VMEM ceiling bytes)."""
    kind = ""
    try:
        kind = jax.devices()[0].device_kind.lower()
    except Exception:
        pass
    if "v7" in kind or "tpu7" in kind or "tpu 7" in kind:
        # v7x: ~3.2 TB/s HBM (0.35us/step tax matters), 2 TCs, 64 MiB physical.
        return 6 << 20, 2, 56 << 20
    if "v6" in kind:
        # v6e: ~1.4 TB/s HBM, 1 TC, 128 MiB physical VMEM.
        return 6 << 20, 1, 100 << 20
    if "v5e" in kind or "v5 lite" in kind or "v5lite" in kind:
        # v5e: 16 MiB scoped-VMEM default -> keep blocks <= ~3 MiB.
        return 3 << 20, 1, 100 << 20
    # Unknown / older generations: conservative.
    return 3 << 20, 1, 48 << 20


def _pick_batch_tile(N, per_image_bytes, target_bytes, tc_per_chip):
    """Largest batch tile under the block budget; Bt | N (no partial blocks).
    The >=tc grid-step cap is applied only on multi-TensorCore chips (v7x)."""
    bt = int(max(1, min(N, target_bytes // max(per_image_bytes, 1))))
    if tc_per_chip >= 2 and N >= tc_per_chip:
        bt = min(bt, max(1, N // tc_per_chip))
    while N % bt:
        bt -= 1
    return bt


def _pick_hw_tile(rows, C, HWp, itemsize, target_bytes):
    """Largest multiple of 128 that divides HWp and fits the block budget."""
    n_lanes = HWp // 128
    for k in range(n_lanes, 0, -1):
        if n_lanes % k == 0 and rows * C * k * 128 * itemsize <= target_bytes:
            return k * 128
    return 128


# ----------------------------------------------------------------------------
# Wrapper
# ----------------------------------------------------------------------------

@functools.partial(jax.jit,
                   static_argnames=("force_two_pass", "_target_bytes_override"))
def squeeze_and_excitation(x_nchw, w1, b1, w2, b2, *, force_two_pass=False,
                           _target_bytes_override=None):
    """SE forward.  x_nchw: (N, C, H, W); w1: (Cr, C), b1: (Cr,),
    w2: (C, Cr), b2: (C,)   (1x1-conv weights with the trailing 1x1 squeezed)."""
    N, C, H, W = x_nchw.shape
    HW = H * W
    Cr = w1.shape[0]
    itemsize = jnp.dtype(x_nchw.dtype).itemsize

    # Lane-dense layout: flatten spatial and zero-pad to a multiple of 128.
    HWp = ((HW + 127) // 128) * 128
    x = x_nchw.reshape(N, C, HW)
    if HWp != HW:
        x = jnp.pad(x, ((0, 0), (0, 0), (0, HWp - HW)))

    # Wrapper-side layout plumbing so the kernel needs no transposes.
    w1t = w1.T                      # (C, Cr)
    w2t = w2.T                      # (Cr, C)
    b1r = b1.reshape(1, Cr)
    b2r = b2.reshape(1, C)

    target_bytes, tc_per_chip, safe_vmem = _chip_params()
    if _target_bytes_override is not None:
        target_bytes = int(_target_bytes_override)
    per_image = C * HWp * itemsize
    inv_hw = 1.0 / HW

    # 4x = (x in + out) x double buffering; margin for weights/bookkeeping.
    oversized = 4 * per_image + (2 << 20) > safe_vmem
    two_pass = bool(force_two_pass) or oversized

    weight_specs = [
        pl.BlockSpec((C, Cr), lambda *idx: (0,) * 2),   # placeholder, replaced below
    ]
    del weight_specs  # (kept explicit per-path below for clarity)

    if not two_pass:
        # ------------------------- single-pass path --------------------------
        bt = _pick_batch_tile(N, per_image, target_bytes, tc_per_chip)
        block_bytes = bt * per_image
        cp_kwargs = dict(dimension_semantics=("parallel",))
        if per_image > target_bytes:
            # Bt floored at 1 and the block exceeds the budget: raise the
            # scoped-VMEM limit (guaranteed <= safe_vmem by the branch above).
            cp_kwargs["vmem_limit_bytes"] = int(
                min(safe_vmem, 4 * block_bytes + (4 << 20)))

        out = pl.pallas_call(
            functools.partial(se_kernel, inv_hw=inv_hw),
            out_shape=jax.ShapeDtypeStruct((N, C, HWp), x.dtype),
            grid_spec=pltpu.PrefetchScalarGridSpec(
                num_scalar_prefetch=0,
                grid=(N // bt,),
                in_specs=[
                    pl.BlockSpec((bt, C, HWp), lambda n: (n, 0, 0)),  # x tile
                    pl.BlockSpec((C, Cr), lambda n: (0, 0)),          # w1^T
                    pl.BlockSpec((1, Cr), lambda n: (0, 0)),          # b1 row
                    pl.BlockSpec((Cr, C), lambda n: (0, 0)),          # w2^T
                    pl.BlockSpec((1, C), lambda n: (0, 0)),           # b2 row
                ],
                out_specs=pl.BlockSpec((bt, C, HWp), lambda n: (n, 0, 0)),
            ),
            compiler_params=pltpu.CompilerParams(**cp_kwargs),
        )(x, w1t, b1r, w2t, b2r)
    else:
        # ------------------ two-pass (spatial-tiled) fallback -----------------
        # Pass A: pooled mean, accumulating over HW tiles (reduction axis last).
        hwt_a = _pick_hw_tile(1, C, HWp, itemsize, target_bytes)
        bt_a = _pick_batch_tile(N, C * hwt_a * itemsize, target_bytes,
                                tc_per_chip)
        pooled = pl.pallas_call(
            functools.partial(pool_kernel, inv_hw=inv_hw),
            out_shape=jax.ShapeDtypeStruct((N, 1, C), jnp.float32),
            grid_spec=pltpu.PrefetchScalarGridSpec(
                num_scalar_prefetch=0,
                grid=(N // bt_a, HWp // hwt_a),
                in_specs=[pl.BlockSpec((bt_a, C, hwt_a),
                                       lambda n, t: (n, 0, t))],
                out_specs=pl.BlockSpec((bt_a, 1, C), lambda n, t: (n, 0, 0)),
            ),
            compiler_params=pltpu.CompilerParams(
                dimension_semantics=("parallel", "arbitrary")),
        )(x)

        # Pass B: FC + sigmoid + scale, streaming (Bt, C, HWt) tiles.
        hwt_b = _pick_hw_tile(1, C, HWp, itemsize, target_bytes)
        bt_b = _pick_batch_tile(N, C * hwt_b * itemsize, target_bytes,
                                tc_per_chip)
        out = pl.pallas_call(
            functools.partial(scale_kernel, bt=bt_b),
            out_shape=jax.ShapeDtypeStruct((N, C, HWp), x.dtype),
            grid_spec=pltpu.PrefetchScalarGridSpec(
                num_scalar_prefetch=0,
                grid=(N // bt_b, HWp // hwt_b),
                in_specs=[
                    pl.BlockSpec((N, 1, C), lambda n, t: (0, 0, 0)),  # pooled
                    pl.BlockSpec((C, Cr), lambda n, t: (0, 0)),       # w1^T
                    pl.BlockSpec((1, Cr), lambda n, t: (0, 0)),       # b1 row
                    pl.BlockSpec((Cr, C), lambda n, t: (0, 0)),       # w2^T
                    pl.BlockSpec((1, C), lambda n, t: (0, 0)),        # b2 row
                    pl.BlockSpec((bt_b, C, hwt_b), lambda n, t: (n, 0, t)),
                ],
                out_specs=pl.BlockSpec((bt_b, C, hwt_b),
                                       lambda n, t: (n, 0, t)),
            ),
            compiler_params=pltpu.CompilerParams(
                dimension_semantics=("parallel", "parallel")),
        )(pooled, w1t, b1r, w2t, b2r, x)

    if HWp != HW:
        out = out[..., :HW]
    return out.reshape(N, C, H, W)


# ----------------------------------------------------------------------------
# Pure-JAX reference (matches the PyTorch module semantics)
# ----------------------------------------------------------------------------

def se_reference(x, w1, b1, w2, b2):
    pooled = jnp.mean(x, axis=(2, 3), keepdims=True)                  # (N,C,1,1)
    h = jnp.einsum("rc,ncij->nrij", w1, pooled) + b1[None, :, None, None]
    h = jnp.maximum(h, 0.0)
    s = jnp.einsum("cr,nrij->ncij", w2, h) + b2[None, :, None, None]
    s = jax.nn.sigmoid(s)
    return x * s


if __name__ == "__main__":
    key = jax.random.PRNGKey(0)

    def make_params(k, C, Cr):
        k1, k2, k3, k4 = jax.random.split(k, 4)
        w1 = jax.random.normal(k1, (Cr, C), dtype=jnp.float32) * 0.1
        b1 = jax.random.normal(k2, (Cr,), dtype=jnp.float32) * 0.1
        w2 = jax.random.normal(k3, (C, Cr), dtype=jnp.float32) * 0.1
        b2 = jax.random.normal(k4, (C,), dtype=jnp.float32) * 0.1
        return w1, b1, w2, b2

    # 1) Main shape: in_dim=64, reduction=16 -> hidden=4; 16x16 spatial
    #    (HW=256, already lane-dense), N=8.
    N, C, H, W = 8, 64, 16, 16
    Cr = C // 16
    k_x, k_p, key = jax.random.split(key, 3)
    x = jax.random.normal(k_x, (N, C, H, W), dtype=jnp.float32)
    w1, b1, w2, b2 = make_params(k_p, C, Cr)

    y = jax.block_until_ready(squeeze_and_excitation(x, w1, b1, w2, b2))
    y_ref = se_reference(x, w1, b1, w2, b2)
    assert jnp.allclose(y, y_ref, atol=1e-5, rtol=1e-5), "f32 single-pass mismatch"

    # 2) bf16 streaming (halves HBM traffic; pooled sum + FCs stay f32).
    xb = x.astype(jnp.bfloat16)
    yb = jax.block_until_ready(squeeze_and_excitation(xb, w1, b1, w2, b2))
    yb_ref = se_reference(xb.astype(jnp.float32), w1, b1, w2, b2)
    assert yb.dtype == jnp.bfloat16
    assert jnp.allclose(yb.astype(jnp.float32), yb_ref, atol=5e-2, rtol=5e-2), \
        "bf16 mismatch"

    # 3) Non-128-multiple spatial (7x7): exercises the lane-padding path.
    N2, C2, H2, W2 = 2, 32, 7, 7
    Cr2 = C2 // 16
    k_x2, k_p2, key = jax.random.split(key, 3)
    x2 = jax.random.normal(k_x2, (N2, C2, H2, W2), dtype=jnp.float32)
    p2 = make_params(k_p2, C2, Cr2)
    y2 = jax.block_until_ready(squeeze_and_excitation(x2, *p2))
    assert jnp.allclose(y2, se_reference(x2, *p2), atol=1e-5, rtol=1e-5), \
        "padded-HW mismatch"

    # 4) Two-pass (spatial-tiled) VMEM-guard fallback, forced at a small shape
    #    with a tiny block budget so both grid axes get multiple steps.
    y3 = jax.block_until_ready(squeeze_and_excitation(
        x, w1, b1, w2, b2, force_two_pass=True, _target_bytes_override=32 << 10))
    assert jnp.allclose(y3, y_ref, atol=1e-5, rtol=1e-5), "two-pass mismatch"

    print("KERNEL_OK")
</pallas_src>

<mosaic_0001>
module attributes {stable_mosaic.version = 11 : i64} {
  func.func @se_kernel(%arg0: i32, %arg1: memref<8x64x256xf32, #tpu.memory_space<vmem>>, %arg2: memref<64x4xf32, #tpu.memory_space<vmem>>, %arg3: memref<1x4xf32, #tpu.memory_space<vmem>>, %arg4: memref<4x64xf32, #tpu.memory_space<vmem>>, %arg5: memref<1x64xf32, #tpu.memory_space<vmem>>, %arg6: memref<8x64x256xf32, #tpu.memory_space<vmem>>) attributes {dimension_semantics = [#tpu.dimension_semantics<parallel>], iteration_bounds = array<i64: 1>, scalar_prefetch = 0 : i64, scratch_operands = 0 : i64, tpu.core_type = #tpu.core_type<tc>, window_params = [{transform_indices = @transform_0, window_bounds = array<i64: 8, 64, 256>}, {pipeline_mode = #tpu.pipeline_mode<synchronous>, transform_indices = @transform_1, window_bounds = array<i64: 64, 4>}, {pipeline_mode = #tpu.pipeline_mode<synchronous>, transform_indices = @transform_2, window_bounds = array<i64: 1, 4>}, {pipeline_mode = #tpu.pipeline_mode<synchronous>, transform_indices = @transform_3, window_bounds = array<i64: 4, 64>}, {pipeline_mode = #tpu.pipeline_mode<synchronous>, transform_indices = @transform_4, window_bounds = array<i64: 1, 64>}, {transform_indices = @transform_5, window_bounds = array<i64: 8, 64, 256>}]} {
    %c0 = arith.constant 0 : index
    %c0_0 = arith.constant 0 : index
    %c0_1 = arith.constant 0 : index
    %0 = vector.load %arg1[%c0, %c0_0, %c0_1] : memref<8x64x256xf32, #tpu.memory_space<vmem>>, vector<8x64x256xf32>
    %cst = arith.constant dense<0.000000e+00> : vector<8x64xf32>
    %1 = vector.multi_reduction <add>, %0, %cst [2] : vector<8x64x256xf32> to vector<8x64xf32>
    %cst_2 = arith.constant 3.906250e-03 : f32
    %2 = vector.broadcast %cst_2 : f32 to vector<8x64xf32>
    %3 = arith.mulf %1, %2 : vector<8x64xf32>
    %c0_3 = arith.constant 0 : index
    %c0_4 = arith.constant 0 : index
    %4 = vector.load %arg2[%c0_3, %c0_4] : memref<64x4xf32, #tpu.memory_space<vmem>>, vector<64x4xf32>
    %cst_5 = arith.constant dense<0.000000e+00> : vector<8x4xf32>
    %5 = tpu.matmul %3, %4, %cst_5 {dimension_numbers = #tpu.dot_dimension_numbers<[1], [0], [0], [1], [0, 0, 1, 1], [], []>} : vector<8x64xf32>, vector<64x4xf32>, vector<8x4xf32> -> vector<8x4xf32>
    %c0_6 = arith.constant 0 : index
    %c0_7 = arith.constant 0 : index
    %6 = vector.load %arg3[%c0_6, %c0_7] : memref<1x4xf32, #tpu.memory_space<vmem>>, vector<1x4xf32>
    %7 = vector.broadcast %6 : vector<1x4xf32> to vector<8x4xf32>
    %8 = arith.addf %5, %7 : vector<8x4xf32>
    %cst_8 = arith.constant 0.000000e+00 : f32
    %9 = vector.broadcast %cst_8 : f32 to vector<8x4xf32>
    %10 = arith.maximumf %8, %9 : vector<8x4xf32>
    %c0_9 = arith.constant 0 : index
    %c0_10 = arith.constant 0 : index
    %11 = vector.load %arg4[%c0_9, %c0_10] : memref<4x64xf32, #tpu.memory_space<vmem>>, vector<4x64xf32>
    %cst_11 = arith.constant dense<0.000000e+00> : vector<8x64xf32>
    %12 = tpu.matmul %10, %11, %cst_11 {dimension_numbers = #tpu.dot_dimension_numbers<[1], [0], [0], [1], [0, 0, 1, 1], [], []>} : vector<8x4xf32>, vector<4x64xf32>, vector<8x64xf32> -> vector<8x64xf32>
    %c0_12 = arith.constant 0 : index
    %c0_13 = arith.constant 0 : index
    %13 = vector.load %arg5[%c0_12, %c0_13] : memref<1x64xf32, #tpu.memory_space<vmem>>, vector<1x64xf32>
    %14 = vector.broadcast %13 : vector<1x64xf32> to vector<8x64xf32>
    %15 = arith.addf %12, %14 : vector<8x64xf32>
    %16 = arith.negf %15 : vector<8x64xf32>
    %17 = math.exp %16 : vector<8x64xf32>
    %cst_14 = arith.constant 1.000000e+00 : f32
    %18 = vector.broadcast %cst_14 : f32 to vector<8x64xf32>
    %19 = arith.addf %18, %17 : vector<8x64xf32>
    %20 = arith.divf %18, %19 : vector<8x64xf32>
    %21 = vector.shape_cast %20 : vector<8x64xf32> to vector<8x64x1xf32>
    %22 = vector.broadcast %21 : vector<8x64x1xf32> to vector<8x64x256xf32>
    %23 = arith.mulf %0, %22 : vector<8x64x256xf32>
    %c0_15 = arith.constant 0 : index
    %c0_16 = arith.constant 0 : index
    %c0_17 = arith.constant 0 : index
    %24 = vector.load %arg6[%c0_15, %c0_16, %c0_17] : memref<8x64x256xf32, #tpu.memory_space<vmem>>, vector<8x64x256xf32>
    tpu.vector_store %arg6[%c0_15, %c0_16, %c0_17], %23 {strides = array<i32>} : memref<8x64x256xf32, #tpu.memory_space<vmem>>, vector<8x64x256xf32>,
    return
  }
  func.func @transform_0(%arg0: i32) -> (i32, i32, i32) {
    %c0_i32 = arith.constant 0 : i32
    %c0_i32_0 = arith.constant 0 : i32
    %c0_i32_1 = arith.constant 0 : i32
    return %arg0, %c0_i32, %c0_i32_0 : i32, i32, i32
  }
  func.func @transform_1(%arg0: i32) -> (i32, i32) {
    %c0_i32 = arith.constant 0 : i32
    %c0_i32_0 = arith.constant 0 : i32
    %c0_i32_1 = arith.constant 0 : i32
    return %c0_i32, %c0_i32_0 : i32, i32
  }
  func.func @transform_2(%arg0: i32) -> (i32, i32) {
    %c0_i32 = arith.constant 0 : i32
    %c0_i32_0 = arith.constant 0 : i32
    %c0_i32_1 = arith.constant 0 : i32
    return %c0_i32, %c0_i32_0 : i32, i32
  }
  func.func @transform_3(%arg0: i32) -> (i32, i32) {
    %c0_i32 = arith.constant 0 : i32
    %c0_i32_0 = arith.constant 0 : i32
    %c0_i32_1 = arith.constant 0 : i32
    return %c0_i32, %c0_i32_0 : i32, i32
  }
  func.func @transform_4(%arg0: i32) -> (i32, i32) {
    %c0_i32 = arith.constant 0 : i32
    %c0_i32_0 = arith.constant 0 : i32
    %c0_i32_1 = arith.constant 0 : i32
    return %c0_i32, %c0_i32_0 : i32, i32
  }
  func.func @transform_5(%arg0: i32) -> (i32, i32, i32) {
    %c0_i32 = arith.constant 0 : i32
    %c0_i32_0 = arith.constant 0 : i32
    %c0_i32_1 = arith.constant 0 : i32
    return %arg0, %c0_i32, %c0_i32_0 : i32, i32, i32
  }
}

</mosaic_0001>

<bundles_post_ra>
// kernel: squeeze_and_excitation.1
= control target key start
LH: loop header
LB: loop body
LE: loop exit
PB: predicated region body
PF: predicated region fallthrough
CT: control target
= control target key end

     0   :  { %vm1707_vm0 = vmmov 0   ;;  %vm494_vm1 = vcmask 130112   ;;  %vm501_vm2 = vcmask 195712   ;;  %vm508_vm3 = vcmask 261312   ;;  %s3232_s0 = inlined_call_operand.vmem [shape: f32[8,64,256], index: 0, kind: input, shape index: {}]   ;;  %s3233_s1 = inlined_call_operand.vmem [shape: f32[64,4], index: 1, kind: input, shape index: {}]   ;;  %s3234_s3 = inlined_call_operand.vmem [shape: f32[4,64], index: 3, kind: input, shape index: {}]   ;;  %s3235_s2 = inlined_call_operand.vmem [shape: f32[1,4], index: 2, kind: input, shape index: {}]   ;;  %s3236_s4 = inlined_call_operand.vmem [shape: f32[1,64], index: 4, kind: input, shape index: {}]   ;;  %s3237_s5 = inlined_call_operand.vmem [shape: f32[8,64,256], index: 5, kind: output, shape index: {}]  }
   0x1   :  { %v36_v0 = vld [vmem:[%s3232_s0 + $0x80] sm:$0xff]  ;;  %v37_v1 = vld [vmem:[%s3232_s0 + $0x88] sm:$0xff]  ;;  %v38_v5 = vld [vmem:[%s3232_s0 + $0x90] sm:$0xff]  ;;  %vm515_vm4 = vcmask 326912   ;;  %vm522_vm5 = vcmask 392512   ;;  %vm529_vm6 = vcmask 458112  }
   0x2   :  { %v20_v2 = vld [vmem:[%s3232_s0] sm:$0xff]  ;;  %v172_v3 = vadd.f32 %v37_v1, %v36_v0  ;;  %v21_v4 = vld [vmem:[%s3232_s0 + $0x8] sm:$0xff]  ;;  %v39_v6 = vld [vmem:[%s3232_s0 + $0x98] sm:$0xff]  ;;  %vm536_vm7 = vcmask 523712   ;;  %vm811_vm8 = vcmask 1041409   ;;  %vm813_vm9 = vcmask 1042434  }
   0x3   :  { %v148_v7 = vadd.f32 %v21_v4, %v20_v2  ;;  %v22_v8 = vld [vmem:[%s3232_s0 + $0x10] sm:$0xff]  ;;  %v23_v9 = vld [vmem:[%s3232_s0 + $0x18] sm:$0xff]  ;;  %v175_v10 = vadd.f32 %v39_v6, %v38_v5  ;;  %v40_v12 = vld [vmem:[%s3232_s0 + $0xa0] sm:$0xff]  ;;  %vm815_vm10 = vcmask 1043459   ;;  %vm817_vm11 = vcmask 1044484  }
   0x4   :  { %173 = vadd.xlane.f32.xlu1 %v172_v3  ;;  %v151_v11 = vadd.f32 %v23_v9, %v22_v8  ;;  %v41_v13 = vld [vmem:[%s3232_s0 + $0xa8] sm:$0xff]  ;;  %v24_v14 = vld [vmem:[%s3232_s0 + $0x20] sm:$0xff]  ;;  %v54_v18 = vld [vmem:[%s3232_s0 + $0x110] sm:$0xff]  ;;  %vm819_vm12 = vcmask 1045509   ;;  %vm821_vm13 = vcmask 1046534   ;;  %vm823_vm14 = vcmask 1047559  }
   0x5   :  { %149 = vadd.xlane.f32.xlu0 %v148_v7  ;;  %v25_v15 = vld [vmem:[%s3232_s0 + $0x28] sm:$0xff]  ;;  %v178_v16 = vadd.f32 %v41_v13, %v40_v12  ;;  %v55_v19 = vld [vmem:[%s3232_s0 + $0x118] sm:$0xff]  ;;  %v52_v20 = vld [vmem:[%s3232_s0 + $0x100] sm:$0xff]  ;;  %vm825_vm15 = vcmask 523264  }
   0x6   :  { %v154_v17 = vadd.f32 %v25_v15, %v24_v14  ;;  %v53_v21 = vld [vmem:[%s3232_s0 + $0x108] sm:$0xff]  ;;  %v199_v22 = vadd.f32 %v55_v19, %v54_v18  ;;  %v42_v24 = vld [vmem:[%s3232_s0 + $0xb0] sm:$0xff]  ;;  %v43_v25 = vld [vmem:[%s3232_s0 + $0xb8] sm:$0xff] }
   0x7   :  { %v196_v23 = vadd.f32 %v53_v21, %v52_v20  ;;  %v26_v26 = vld [vmem:[%s3232_s0 + $0x30] sm:$0xff]  ;;  %v27_v27 = vld [vmem:[%s3232_s0 + $0x38] sm:$0xff]  ;;  %v181_v28 = vadd.f32 %v43_v25, %v42_v24  ;;  %v68_v30 = vld [vmem:[%s3232_s0 + $0x180] sm:$0xff] }
   0x8   :  { %176 = vadd.xlane.f32.xlu1 %v175_v10  ;;  %v157_v29 = vadd.f32 %v27_v27, %v26_v26  ;;  %v69_v31 = vld [vmem:[%s3232_s0 + $0x188] sm:$0xff]  ;;  %v56_v32 = vld [vmem:[%s3232_s0 + $0x120] sm:$0xff]  ;;  %v70_v38 = vld [vmem:[%s3232_s0 + $0x190] sm:$0xff] }
   0x9   :  { %152 = vadd.xlane.f32.xlu0 %v151_v11  ;;  %v57_v33 = vld [vmem:[%s3232_s0 + $0x128] sm:$0xff]  ;;  %v220_v34 = vadd.f32 %v69_v31, %v68_v30  ;;  %v28_v36 = vld [vmem:[%s3232_s0 + $0x40] sm:$0xff]  ;;  %v71_v39 = vld [vmem:[%s3232_s0 + $0x198] sm:$0xff] }
   0xa   :  { %v202_v35 = vadd.f32 %v57_v33, %v56_v32  ;;  %v29_v37 = vld [vmem:[%s3232_s0 + $0x48] sm:$0xff]  ;;  %v223_v41 = vadd.f32 %v71_v39, %v70_v38  ;;  %v58_v42 = vld [vmem:[%s3232_s0 + $0x130] sm:$0xff]  ;;  %v59_v43 = vld [vmem:[%s3232_s0 + $0x138] sm:$0xff] }
   0xb   :  { %v160_v40 = vadd.f32 %v29_v37, %v28_v36  ;;  %v44_v44 = vld [vmem:[%s3232_s0 + $0xc0] sm:$0xff]  ;;  %v45_v45 = vld [vmem:[%s3232_s0 + $0xc8] sm:$0xff]  ;;  %v205_v46 = vadd.f32 %v59_v43, %v58_v42  ;;  %v30_v54 = vld [vmem:[%s3232_s0 + $0x50] sm:$0xff] }
   0xc   :  { %179 = vadd.xlane.f32.xlu1 %v178_v16  ;;  %v184_v47 = vadd.f32 %v45_v45, %v44_v44  ;;  %v84_v48 = vld [vmem:[%s3232_s0 + $0x200] sm:$0xff]  ;;  %v85_v49 = vld [vmem:[%s3232_s0 + $0x208] sm:$0xff]  ;;  %v31_v55 = vld [vmem:[%s3232_s0 + $0x58] sm:$0xff] }
   0xd   :  { %155 = vadd.xlane.f32.xlu0 %v154_v17  ;;  %v72_v50 = vld [vmem:[%s3232_s0 + $0x1a0] sm:$0xff]  ;;  %v73_v51 = vld [vmem:[%s3232_s0 + $0x1a8] sm:$0xff]  ;;  %v244_v52 = vadd.f32 %v85_v49, %v84_v48  ;;  %v86_v56 = vld [vmem:[%s3232_s0 + $0x210] sm:$0xff]  ;;  %v163_v58 = vadd.f32 %v31_v55, %v30_v54 }
   0xe   :  { %v226_v53 = vadd.f32 %v73_v51, %v72_v50  ;;  %v87_v57 = vld [vmem:[%s3232_s0 + $0x218] sm:$0xff]  ;;  %v60_v60 = vld [vmem:[%s3232_s0 + $0x140] sm:$0xff]  ;;  %v61_v61 = vld [vmem:[%s3232_s0 + $0x148] sm:$0xff] }
   0xf   :  { %v247_v59 = vadd.f32 %v87_v57, %v86_v56  ;;  %v46_v62 = vld [vmem:[%s3232_s0 + $0xd0] sm:$0xff]  ;;  %v47_v63 = vld [vmem:[%s3232_s0 + $0xd8] sm:$0xff]  ;;  %v208_v0 = vadd.f32 %v61_v61, %v60_v60  ;;  %v88_v2 = vld [vmem:[%s3232_s0 + $0x220] sm:$0xff] }
  0x10   :  { %200 = vadd.xlane.f32.xlu1 %v199_v22  ;;  %v187_v1 = vadd.f32 %v47_v63, %v46_v62  ;;  %v89_v3 = vld [vmem:[%s3232_s0 + $0x228] sm:$0xff]  ;;  %v74_v4 = vld [vmem:[%s3232_s0 + $0x1b0] sm:$0xff]  ;;  %v75_v5 = vld [vmem:[%s3232_s0 + $0x1b8] sm:$0xff] }
  0x11   :  { %197 = vadd.xlane.f32.xlu0 %v196_v23  ;;  %v250_v6 = vadd.f32 %v89_v3, %v88_v2  ;;  %v229_v7 = vadd.f32 %v75_v5, %v74_v4  ;;  %v102_v8 = vld [vmem:[%s3232_s0 + $0x290] sm:$0xff]  ;;  %v103_v9 = vld [vmem:[%s3232_s0 + $0x298] sm:$0xff]  ;;  %v100_v10 = vld [vmem:[%s3232_s0 + $0x280] sm:$0xff] }
  0x12   :  { %v101_v11 = vld [vmem:[%s3232_s0 + $0x288] sm:$0xff]  ;;  %v271_v12 = vadd.f32 %v103_v9, %v102_v8  ;;  %v48_v14 = vld [vmem:[%s3232_s0 + $0xe0] sm:$0xff]  ;;  %v62_v22 = vld [vmem:[%s3232_s0 + $0x150] sm:$0xff] }
  0x13   :  { %v268_v13 = vadd.f32 %v101_v11, %v100_v10  ;;  %v49_v15 = vld [vmem:[%s3232_s0 + $0xe8] sm:$0xff]  ;;  %v32_v16 = vld [vmem:[%s3232_s0 + $0x60] sm:$0xff]  ;;  %v63_v23 = vld [vmem:[%s3232_s0 + $0x158] sm:$0xff] }
  0x14   :  { %182 = vadd.xlane.f32.xlu1 %v181_v28  ;;  %v33_v17 = vld [vmem:[%s3232_s0 + $0x68] sm:$0xff]  ;;  %v190_v18 = vadd.f32 %v49_v15, %v48_v14  ;;  %v76_v20 = vld [vmem:[%s3232_s0 + $0x1c0] sm:$0xff]  ;;  %v211_v25 = vadd.f32 %v63_v23, %v62_v22  ;;  %v90_v28 = vld [vmem:[%s3232_s0 + $0x230] sm:$0xff] }
  0x15   :  { %158 = vadd.xlane.f32.xlu0 %v157_v29  ;;  %v166_v19 = vadd.f32 %v33_v17, %v32_v16  ;;  %v77_v21 = vld [vmem:[%s3232_s0 + $0x1c8] sm:$0xff]  ;;  %v104_v26 = vld [vmem:[%s3232_s0 + $0x2a0] sm:$0xff]  ;;  %v91_v29 = vld [vmem:[%s3232_s0 + $0x238] sm:$0xff] }
  0x16   :  { %v232_v24 = vadd.f32 %v77_v21, %v76_v20  ;;  %v105_v27 = vld [vmem:[%s3232_s0 + $0x2a8] sm:$0xff]  ;;  %v253_v31 = vadd.f32 %v91_v29, %v90_v28  ;;  %v118_v32 = vld [vmem:[%s3232_s0 + $0x310] sm:$0xff]  ;;  %v119_v33 = vld [vmem:[%s3232_s0 + $0x318] sm:$0xff] }
  0x17   :  { %v274_v30 = vadd.f32 %v105_v27, %v104_v26  ;;  %v295_v36 = vadd.f32 %v119_v33, %v118_v32  ;;  %v50_v38 = vld [vmem:[%s3232_s0 + $0xf0] sm:$0xff]  ;;  %v51_v39 = vld [vmem:[%s3232_s0 + $0xf8] sm:$0xff]  ;;  %v132_v56 = vld [vmem:[%s3232_s0 + $0x380] sm:$0xff] }
  0x18   :  { %221 = vadd.xlane.f32.xlu1 %v220_v34  ;;  %v116_v34 = vld [vmem:[%s3232_s0 + $0x300] sm:$0xff]  ;;  %v193_v42 = vadd.f32 %v51_v39, %v50_v38  ;;  %v78_v44 = vld [vmem:[%s3232_s0 + $0x1d0] sm:$0xff]  ;;  %v79_v45 = vld [vmem:[%s3232_s0 + $0x1d8] sm:$0xff] }
  0x19   :  { %203 = vadd.xlane.f32.xlu0 %v202_v35  ;;  %v117_v35 = vld [vmem:[%s3232_s0 + $0x308] sm:$0xff]  ;;  %v235_v48 = vadd.f32 %v79_v45, %v78_v44  ;;  %v106_v50 = vld [vmem:[%s3232_s0 + $0x2b0] sm:$0xff]  ;;  %v107_v51 = vld [vmem:[%s3232_s0 + $0x2b8] sm:$0xff] }
  0x1a   :  { %v292_v37 = vadd.f32 %v117_v35, %v116_v34  ;;  %v277_v54 = vadd.f32 %v107_v51, %v106_v50  ;;  %v133_v57 = vld [vmem:[%s3232_s0 + $0x388] sm:$0xff]  ;;  %v66_v62 = vld [vmem:[%s3232_s0 + $0x170] sm:$0xff]  ;;  %v67_v63 = vld [vmem:[%s3232_s0 + $0x178] sm:$0xff] }
  0x1b   :  { %v316_v60 = vadd.f32 %v133_v57, %v132_v56  ;;  %v217_v2 = vadd.f32 %v67_v63, %v66_v62  ;;  %v94_v4 = vld [vmem:[%s3232_s0 + $0x250] sm:$0xff]  ;;  %v95_v5 = vld [vmem:[%s3232_s0 + $0x258] sm:$0xff]  ;;  %v112_v34 = vld [vmem:[%s3232_s0 + $0x2e0] sm:$0xff] }
  0x1c   :  { %161 = vadd.xlane.f32.xlu1 %v160_v40  ;;  %v34_v40 = vld [vmem:[%s3232_s0 + $0x70] sm:$0xff]  ;;  %v259_v8 = vadd.f32 %v95_v5, %v94_v4  ;;  %v123_v11 = vld [vmem:[%s3232_s0 + $0x338] sm:$0xff]  ;;  %v113_v35 = vld [vmem:[%s3232_s0 + $0x2e8] sm:$0xff] }
  0x1d   :  { %224 = vadd.xlane.f32.xlu0 %v223_v41  ;;  %v35_v41 = vld [vmem:[%s3232_s0 + $0x78] sm:$0xff]  ;;  %v122_v10 = vld [vmem:[%s3232_s0 + $0x330] sm:$0xff]  ;;  %v286_v38 = vadd.f32 %v113_v35, %v112_v34  ;;  %v408_v4 = vld [vmem:[%s3233_s1 + $0x20] sm:$0xff] }
  0x1e   :  { %v169_v43 = vadd.f32 %v35_v41, %v34_v40  ;;  %v301_v14 = vadd.f32 %v123_v11, %v122_v10  ;;  %v82_v16 = vld [vmem:[%s3232_s0 + $0x1f0] sm:$0xff]  ;;  %v83_v17 = vld [vmem:[%s3232_s0 + $0x1f8] sm:$0xff]  ;;  %v140_v40 = vld [vmem:[%s3232_s0 + $0x3c0] sm:$0xff] }
  0x1f   :  { %v241_v20 = vadd.f32 %v83_v17, %v82_v16  ;;  %v110_v22 = vld [vmem:[%s3232_s0 + $0x2d0] sm:$0xff]  ;;  %v111_v23 = vld [vmem:[%s3232_s0 + $0x2d8] sm:$0xff]  ;;  %v141_v41 = vld [vmem:[%s3232_s0 + $0x3c8] sm:$0xff] }
  0x20   :  { %206 = vadd.xlane.f32.xlu1 %v205_v46  ;;  %v64_v46 = vld [vmem:[%s3232_s0 + $0x160] sm:$0xff]  ;;  %v283_v26 = vadd.f32 %v111_v23, %v110_v22  ;;  %v138_v28 = vld [vmem:[%s3232_s0 + $0x3b0] sm:$0xff]  ;;  %v139_v29 = vld [vmem:[%s3232_s0 + $0x3b8] sm:$0xff]  ;;  %v328_v44 = vadd.f32 %v141_v41, %v140_v40 }
  0x21   :  { %185 = vadd.xlane.f32.xlu0 %v184_v47  ;;  %v65_v47 = vld [vmem:[%s3232_s0 + $0x168] sm:$0xff]  ;;  %v325_v32 = vadd.f32 %v139_v29, %v138_v28  ;;  %v407_v5 = vld [vmem:[%s3233_s1 + $0x18] sm:$0xff]  ;;  %v404_v10 = vld [vmem:[%s3233_s1] sm:$0xff] }
  0x22   :  { %v214_v49 = vadd.f32 %v65_v47, %v64_v46  ;;  %v128_v46 = vld [vmem:[%s3232_s0 + $0x360] sm:$0xff]  ;;  %v129_v47 = vld [vmem:[%s3232_s0 + $0x368] sm:$0xff] }
  0x23   :  { %v310_v50 = vadd.f32 %v129_v47, %v128_v46 }
  0x24   :  { %245 = vadd.xlane.f32.xlu1 %v244_v52  ;;  %v92_v52 = vld [vmem:[%s3232_s0 + $0x240] sm:$0xff] }
  0x25   :  { %227 = vadd.xlane.f32.xlu0 %v226_v53  ;;  %v93_v53 = vld [vmem:[%s3232_s0 + $0x248] sm:$0xff] }
  0x26   :  { %v256_v55 = vadd.f32 %v93_v53, %v92_v52  ;;  %v130_v52 = vld [vmem:[%s3232_s0 + $0x370] sm:$0xff]  ;;  %v131_v53 = vld [vmem:[%s3232_s0 + $0x378] sm:$0xff] }
  0x27   :  { %v313_v56 = vadd.f32 %v131_v53, %v130_v52 }
  0x28   :  { %164 = vadd.xlane.f32.xlu1 %v163_v58  ;;  %v120_v58 = vld [vmem:[%s3232_s0 + $0x320] sm:$0xff] }
  0x29   :  { %248 = vadd.xlane.f32.xlu0 %v247_v59  ;;  %v121_v59 = vld [vmem:[%s3232_s0 + $0x328] sm:$0xff] }
  0x2a   :  { %v298_v61 = vadd.f32 %v121_v59, %v120_v58  ;;  %v146_v58 = vld [vmem:[%s3232_s0 + $0x3f0] sm:$0xff]  ;;  %v147_v59 = vld [vmem:[%s3232_s0 + $0x3f8] sm:$0xff] }
  0x2b   :  { %v337_v62 = vadd.f32 %v147_v59, %v146_v58 }
  0x2c   :  { %209 = vadd.xlane.f32.xlu1 %v208_v0  ;;  %v134_v0 = vld [vmem:[%s3232_s0 + $0x390] sm:$0xff] }
  0x2d   :  { %188 = vadd.xlane.f32.xlu0 %v187_v1  ;;  %v135_v1 = vld [vmem:[%s3232_s0 + $0x398] sm:$0xff] }
  0x2e   :  { %v319_v3 = vadd.f32 %v135_v1, %v134_v0  ;;  %v1706_v0 = vmov 0.0   ;;  %v411_v1 = vld [vmem:[%s3233_s1 + $0x38] sm:$0xff] }
  0x2f   :  { %1548 = vmatprep.subr.mxu0 %v1706_v0  ;;  %1567 = vmatprep.subr.mxu1 %v1706_v0 }
  0x30   :  { %251 = vadd.xlane.f32.xlu1 %v250_v6  ;;  %v80_v6 = vld [vmem:[%s3232_s0 + $0x1e0] sm:$0xff]  ;;  %1549 = vmatpush3.msra.mxu0 %v411_v1 }
  0x31   :  { %230 = vadd.xlane.f32.xlu0 %v229_v7  ;;  %v81_v7 = vld [vmem:[%s3232_s0 + $0x1e8] sm:$0xff]  ;;  %1550 = vmatprep.subr.mxu0 %v1706_v0 }
  0x32   :  { %v238_v9 = vadd.f32 %v81_v7, %v80_v6  ;;  %v406_v6 = vld [vmem:[%s3233_s1 + $0x10] sm:$0xff]  ;;  %1564 = vmatprep.mubr.msk.f32.mxu0 %vm1707_vm0, %v1706_v0  ;;  %1569 = vmatprep.mubr.msk.f32.mxu1 %vm1707_vm0, %v1706_v0  ;;  %vm911_vm0 = vcmask 1043456  }
  0x34   :  { %272 = vadd.xlane.f32.xlu1 %v271_v12  ;;  %v108_v12 = vld [vmem:[%s3232_s0 + $0x2c0] sm:$0xff] }
  0x35   :  { %269 = vadd.xlane.f32.xlu0 %v268_v13  ;;  %v109_v13 = vld [vmem:[%s3232_s0 + $0x2c8] sm:$0xff] }
  0x36   :  { %v280_v15 = vadd.f32 %v109_v13, %v108_v12 }
  0x38   :  { %191 = vadd.xlane.f32.xlu1 %v190_v18  ;;  %v136_v18 = vld [vmem:[%s3232_s0 + $0x3a0] sm:$0xff] }
  0x39   :  { %167 = vadd.xlane.f32.xlu0 %v166_v19  ;;  %v137_v19 = vld [vmem:[%s3232_s0 + $0x3a8] sm:$0xff] }
  0x3a   :  { %v322_v21 = vadd.f32 %v137_v19, %v136_v18 }
  0x3c   :  { %233 = vadd.xlane.f32.xlu1 %v232_v24  ;;  %v96_v24 = vld [vmem:[%s3232_s0 + $0x260] sm:$0xff] }
  0x3d   :  { %212 = vadd.xlane.f32.xlu0 %v211_v25  ;;  %v97_v25 = vld [vmem:[%s3232_s0 + $0x268] sm:$0xff] }
  0x3e   :  { %v262_v27 = vadd.f32 %v97_v25, %v96_v24 }
  0x40   :  { %275 = vadd.xlane.f32.xlu1 %v274_v30  ;;  %v124_v30 = vld [vmem:[%s3232_s0 + $0x340] sm:$0xff] }
  0x41   :  { %254 = vadd.xlane.f32.xlu0 %v253_v31  ;;  %v125_v31 = vld [vmem:[%s3232_s0 + $0x348] sm:$0xff] }
  0x42   :  { %v304_v33 = vadd.f32 %v125_v31, %v124_v30 }
  0x44   :  { %296 = vadd.xlane.f32.xlu1 %v295_v36  ;;  %v98_v36 = vld [vmem:[%s3232_s0 + $0x270] sm:$0xff] }
  0x45   :  { %293 = vadd.xlane.f32.xlu0 %v292_v37  ;;  %v99_v37 = vld [vmem:[%s3232_s0 + $0x278] sm:$0xff] }
  0x46   :  { %v265_v39 = vadd.f32 %v99_v37, %v98_v36 }
  0x48   :  { %194 = vadd.xlane.f32.xlu1 %v193_v42  ;;  %v126_v42 = vld [vmem:[%s3232_s0 + $0x350] sm:$0xff] }
  0x49   :  { %170 = vadd.xlane.f32.xlu0 %v169_v43  ;;  %v127_v43 = vld [vmem:[%s3232_s0 + $0x358] sm:$0xff] }
  0x4a   :  { %v307_v45 = vadd.f32 %v127_v43, %v126_v42 }
  0x4c   :  { %236 = vadd.xlane.f32.xlu1 %v235_v48  ;;  %v114_v48 = vld [vmem:[%s3232_s0 + $0x2f0] sm:$0xff] }
  0x4d   :  { %215 = vadd.xlane.f32.xlu0 %v214_v49  ;;  %v115_v49 = vld [vmem:[%s3232_s0 + $0x2f8] sm:$0xff] }
  0x4e   :  { %v289_v51 = vadd.f32 %v115_v49, %v114_v48 }
  0x50   :  { %278 = vadd.xlane.f32.xlu1 %v277_v54  ;;  %v142_v54 = vld [vmem:[%s3232_s0 + $0x3d0] sm:$0xff] }
  0x51   :  { %257 = vadd.xlane.f32.xlu0 %v256_v55  ;;  %v143_v55 = vld [vmem:[%s3232_s0 + $0x3d8] sm:$0xff] }
  0x52   :  { %v331_v57 = vadd.f32 %v143_v55, %v142_v54 }
  0x54   :  { %317 = vadd.xlane.f32.xlu1 %v316_v60  ;;  %v144_v60 = vld [vmem:[%s3232_s0 + $0x3e0] sm:$0xff] }
  0x55   :  { %299 = vadd.xlane.f32.xlu0 %v298_v61  ;;  %v145_v61 = vld [vmem:[%s3232_s0 + $0x3e8] sm:$0xff] }
  0x56   :  { %v334_v63 = vadd.f32 %v145_v61, %v144_v60 }
  0x58   :  { %218 = vadd.xlane.f32.xlu1 %v217_v2  ;;  %v410_v2 = vld [vmem:[%s3233_s1 + $0x30] sm:$0xff] }
  0x59   :  { %320 = vadd.xlane.f32.xlu0 %v319_v3  ;;  %1551 = vmatpush3.msra.mxu0 %v410_v2  ;;  %v409_v3 = vld [vmem:[%s3233_s1 + $0x28] sm:$0xff] }
  0x5a   :  { %1552 = vmatprep.subr.mxu0 %v1706_v0 }
  0x5b   :  { %1553 = vmatpush3.msra.mxu0 %v409_v3 }
  0x5c   :  { %260 = vadd.xlane.f32.xlu1 %v259_v8  ;;  %1554 = vmatprep.subr.mxu0 %v1706_v0 }
  0x5d   :  { %239 = vadd.xlane.f32.xlu0 %v238_v9  ;;  %1555 = vmatpush3.msra.mxu0 %v408_v4  ;;  %v405_v9 = vld [vmem:[%s3233_s1 + $0x8] sm:$0xff] }
  0x5e   :  { %1556 = vmatprep.subr.mxu0 %v1706_v0 }
  0x5f   :  { %1557 = vmatpush3.msra.mxu0 %v407_v5 }
  0x60   :  { %302 = vadd.xlane.f32.xlu1 %v301_v14  ;;  %1558 = vmatprep.subr.mxu0 %v1706_v0 }
  0x61   :  { %281 = vadd.xlane.f32.xlu0 %v280_v15  ;;  %1559 = vmatpush3.msra.mxu0 %v406_v6 }
  0x62   :  { %1560 = vmatprep.subr.mxu0 %v1706_v0 }
  0x63   :  { %1561 = vmatpush3.msra.mxu0 %v405_v9 }
  0x64   :  { %242 = vadd.xlane.f32.xlu1 %v241_v20  ;;  %1562 = vmatprep.subr.mxu0 %v1706_v0 }
  0x65   :  { %323 = vadd.xlane.f32.xlu0 %v322_v21  ;;  %1563 = vmatpush3.msra.mxu0 %v404_v10 }
  0x68   :  { %284 = vadd.xlane.f32.xlu1 %v283_v26 }
  0x69   :  { %263 = vadd.xlane.f32.xlu0 %v262_v27 }
  0x6c   :  { %326 = vadd.xlane.f32.xlu1 %v325_v32 }
  0x6d   :  { %305 = vadd.xlane.f32.xlu0 %v304_v33 }
  0x70   :  { %287 = vadd.xlane.f32.xlu1 %v286_v38 }
  0x71   :  { %266 = vadd.xlane.f32.xlu0 %v265_v39 }
  0x74   :  { %329 = vadd.xlane.f32.xlu1 %v328_v44 }
  0x75   :  { %308 = vadd.xlane.f32.xlu0 %v307_v45  ;;  %v483_v45 = vlaneseq }
  0x77   :  { %v484_v48 = vand.u32 127, %v483_v45  ;;  %v2202_v49 = vshrl.u32 %v483_v45, 7 }
  0x78   :  { %311 = vadd.xlane.f32.xlu1 %v310_v50 }
  0x79   :  { %290 = vadd.xlane.f32.xlu0 %v289_v51  ;;  %v489_v50 = vadd.s32 4294967288, %v484_v48  ;;  %v496_v51 = vadd.s32 4294967280, %v484_v48  ;;  %v503_v53 = vadd.s32 4294967272, %v484_v48  ;;  %v510_v55 = vadd.s32 4294967264, %v484_v48 }
  0x7a   :  { %v517_v10 = vadd.s32 4294967256, %v484_v48 }
  0x7b   :  { %v2212_v58 = vsub.s32 %v489_v50, %v2202_v49  ;;  %v2215_v59 = vsub.s32 %v496_v51, %v2202_v49  ;;  %v2220_v0 = vsub.s32 %v503_v53, %v2202_v49  ;;  %v2225_v4 = vsub.s32 %v510_v55, %v2202_v49 }
  0x7c   :  { %314 = vadd.xlane.f32.xlu1 %v313_v56  ;;  %v2209_v56 = vsub.s32 %v484_v48, %v2202_v49 }
  0x7d   :  { %332 = vadd.xlane.f32.xlu0 %v331_v57 }
  0x80   :  { %338 = vadd.xlane.f32.xlu1 %v337_v62 }
  0x81   :  { %335 = vadd.xlane.f32.xlu0 %v334_v63 }
  0x8d   :  { %v174_v7 = vpop.xlane.xlu1 %173 }
  0x8e   :  { %v150_v8 = vpop.xlane.xlu0 %149  ;;  %v348_v57 = vmul.f32 0.00390625, %v174_v7 }
  0x8f   :  { %v340_v61 = vmul.f32 0.00390625, %v150_v8 }
  0x90   :  { %v541_v8 = vrot.slane %v348_v57, %v2209_v56 }
  0x91   :  { %v177_v11 = vpop.xlane.xlu1 %176  ;;  %v488_v50 = vrot.slane %v340_v61, %v2209_v56 }
  0x92   :  { %v153_v12 = vpop.xlane.xlu0 %152  ;;  %v349_v62 = vmul.f32 0.00390625, %v177_v11  ;;  %v524_v11 = vadd.s32 4294967248, %v484_v48 }
  0x93   :  { %v341_v63 = vmul.f32 0.00390625, %v153_v12  ;;  %v531_v12 = vadd.s32 4294967240, %v484_v48 }
  0x95   :  { %v180_v13 = vpop.xlane.xlu1 %179 }
  0x96   :  { %v156_v14 = vpop.xlane.xlu0 %155  ;;  %v350_v2 = vmul.f32 0.00390625, %v180_v13  ;;  %v545_v13 = vrot.slane %v349_v62, %v2212_v58  ;;  %v2246_v62 = vsub.s32 %v517_v10, %v2202_v49 }
  0x97   :  { %v342_v3 = vmul.f32 0.00390625, %v156_v14  ;;  %v493_v14 = vrot.slane %v341_v63, %v2212_v58  ;;  %v2249_v63 = vsub.s32 %v524_v11, %v2202_v49 }
  0x99   :  { %v201_v15 = vpop.xlane.xlu1 %200 }
  0x9a   :  { %v198_v16 = vpop.xlane.xlu0 %197  ;;  %v357_v5 = vmul.f32 0.00390625, %v201_v15 }
  0x9b   :  { %v356_v6 = vmul.f32 0.00390625, %v198_v16  ;;  %v550_v16 = vrot.slane %v350_v2, %v2215_v59  ;;  %v546_v2 = vsel %vm494_vm1, %v545_v13, %v541_v8 }
  0x9c   :  { %v584_v53 = vrot.slane %v357_v5, %v2212_v58 }
  0x9d   :  { %v183_v17 = vpop.xlane.xlu1 %182  ;;  %v580_v55 = vrot.slane %v356_v6, %v2209_v56 }
  0x9e   :  { %v159_v18 = vpop.xlane.xlu0 %158  ;;  %v351_v7 = vmul.f32 0.00390625, %v183_v17  ;;  %v500_v17 = vrot.slane %v342_v3, %v2215_v59  ;;  %v495_v3 = vsel %vm494_vm1, %v493_v14, %v488_v50 }
  0x9f   :  { %v343_v9 = vmul.f32 0.00390625, %v159_v18 }
  0xa0   :  { %v555_v57 = vrot.slane %v351_v7, %v2220_v0  ;;  %v551_v7 = vsel %vm501_vm2, %v550_v16, %v546_v2 }
  0xa1   :  { %v2146_v19 = vpop.xlane.xlu1 %221  ;;  %v507_v61 = vrot.slane %v343_v9, %v2220_v0  ;;  %v502_v9 = vsel %vm501_vm2, %v500_v17, %v495_v3 }
  0xa2   :  { %v2148_v20 = vpop.xlane.xlu0 %203  ;;  %v556_v8 = vsel %vm508_vm3, %v555_v57, %v551_v7 }
  0xa3   :  { %v358_v51 = vmul.f32 0.00390625, %v2148_v20  ;;  %v364_v20 = vmul.f32 0.00390625, %v2146_v19  ;;  %v509_v50 = vsel %vm508_vm3, %v507_v61, %v502_v9 }
  0xa5   :  { %v2150_v21 = vpop.xlane.xlu1 %161  ;;  %v589_v5 = vrot.slane %v358_v51, %v2215_v59 }
  0xa6   :  { %v2152_v22 = vpop.xlane.xlu0 %224  ;;  %v344_v18 = vmul.f32 0.00390625, %v2150_v21  ;;  %v2252_v21 = vsub.s32 %v531_v12, %v2202_v49  ;;  %v585_v12 = vsel %vm494_vm1, %v584_v53, %v580_v55 }
  0xa7   :  { %v365_v48 = vmul.f32 0.00390625, %v2152_v22 }
  0xa8   :  { %v514_v10 = vrot.slane %v344_v18, %v2225_v4  ;;  %v590_v18 = vsel %vm501_vm2, %v589_v5, %v585_v12 }
  0xa9   :  { %v2154_v23 = vpop.xlane.xlu1 %206  ;;  %v623_v11 = vrot.slane %v365_v48, %v2212_v58 }
  0xaa   :  { %v2156_v24 = vpop.xlane.xlu0 %185  ;;  %v359_v6 = vmul.f32 0.00390625, %v2154_v23  ;;  %v619_v23 = vrot.slane %v364_v20, %v2209_v56  ;;  %v516_v57 = vsel %vm515_vm4, %v514_v10, %v509_v50 }
  0xab   :  { %v352_v13 = vmul.f32 0.00390625, %v2156_v24 }
  0xac   :  { %v594_v48 = vrot.slane %v359_v6, %v2220_v0 }
  0xad   :  { %v2158_v25 = vpop.xlane.xlu1 %245  ;;  %v560_v61 = vrot.slane %v352_v13, %v2225_v4 }
  0xae   :  { %v2160_v26 = vpop.xlane.xlu0 %227  ;;  %v372_v53 = vmul.f32 0.00390625, %v2158_v25 }
  0xaf   :  { %v366_v14 = vmul.f32 0.00390625, %v2160_v26  ;;  %v624_v26 = vsel %vm494_vm1, %v623_v11, %v619_v23  ;;  %v561_v12 = vsel %vm515_vm4, %v560_v61, %v556_v8 }
  0xb1   :  { %v2162_v27 = vpop.xlane.xlu1 %164 }
  0xb2   :  { %v2164_v28 = vpop.xlane.xlu0 %248  ;;  %v345_v51 = vmul.f32 0.00390625, %v2162_v27 }
  0xb3   :  { %v373_v16 = vmul.f32 0.00390625, %v2164_v28 }
  0xb4   :  { %v521_v3 = vrot.slane %v345_v51, %v2246_v62 }
  0xb5   :  { %v2166_v29 = vpop.xlane.xlu1 %209  ;;  %v662_v5 = vrot.slane %v373_v16, %v2212_v58 }
  0xb6   :  { %v2168_v30 = vpop.xlane.xlu0 %188  ;;  %v360_v55 = vmul.f32 0.00390625, %v2166_v29  ;;  %v628_v29 = vrot.slane %v366_v14, %v2215_v59  ;;  %v523_v14 = vsel %vm522_vm5, %v521_v3, %v516_v57 }
  0xb7   :  { %v353_v27 = vmul.f32 0.00390625, %v2168_v30  ;;  %v595_v30 = vsel %vm508_vm3, %v594_v48, %v590_v18 }
  0xb9   :  { %v2170_v31 = vpop.xlane.xlu1 %251 }
  0xba   :  { %v2172_v32 = vpop.xlane.xlu0 %230  ;;  %v374_v28 = vmul.f32 0.00390625, %v2170_v31  ;;  %v658_v31 = vrot.slane %v372_v53, %v2209_v56 }
  0xbb   :  { %v367_v20 = vmul.f32 0.00390625, %v2172_v32  ;;  %v599_v32 = vrot.slane %v360_v55, %v2225_v4 }
  0xbc   :  { %v667_v10 = vrot.slane %v374_v28, %v2215_v59  ;;  %v663_v51 = vsel %vm494_vm1, %v662_v5, %v658_v31 }
  0xbd   :  { %v2174_v33 = vpop.xlane.xlu1 %272  ;;  %v633_v50 = vrot.slane %v367_v20, %v2220_v0 }
  0xbe   :  { %v2176_v34 = vpop.xlane.xlu0 %269  ;;  %v381_v2 = vmul.f32 0.00390625, %v2174_v33  ;;  %v668_v57 = vsel %vm501_vm2, %v667_v10, %v663_v51 }
  0xbf   :  { %v380_v25 = vmul.f32 0.00390625, %v2176_v34  ;;  %v565_v34 = vrot.slane %v353_v27, %v2246_v62 }
  0xc0   :  { %v701_v13 = vrot.slane %v381_v2, %v2212_v58 }
  0xc1   :  { %v2178_v35 = vpop.xlane.xlu1 %191  ;;  %v697_v23 = vrot.slane %v380_v25, %v2209_v56  ;;  %v566_v55 = vsel %vm522_vm5, %v565_v34, %v561_v12 }
  0xc2   :  { %v2180_v36 = vpop.xlane.xlu0 %167  ;;  %v354_v6 = vmul.f32 0.00390625, %v2178_v35 }
  0xc3   :  { %v346_v33 = vmul.f32 0.00390625, %v2180_v36  ;;  %v629_v36 = vsel %vm501_vm2, %v628_v29, %v624_v26  ;;  %v702_v61 = vsel %vm494_vm1, %v701_v13, %v697_v23 }
  0xc4   :  { %v570_v16 = vrot.slane %v354_v6, %v2249_v63  ;;  %v634_v28 = vsel %vm508_vm3, %v633_v50, %v629_v36 }
  0xc5   :  { %v2182_v37 = vpop.xlane.xlu1 %233  ;;  %v528_v8 = vrot.slane %v346_v33, %v2249_v63 }
  0xc6   :  { %v2184_v38 = vpop.xlane.xlu0 %212  ;;  %v368_v11 = vmul.f32 0.00390625, %v2182_v37 }
  0xc7   :  { %v361_v35 = vmul.f32 0.00390625, %v2184_v38  ;;  %v600_v38 = vsel %vm515_vm4, %v599_v32, %v595_v30  ;;  %v530_v5 = vsel %vm529_vm6, %v528_v8, %v523_v14 }
  0xc8   :  { %v638_v26 = vrot.slane %v368_v11, %v2225_v4 }
  0xc9   :  { %v2186_v39 = vpop.xlane.xlu1 %275  ;;  %v604_v27 = vrot.slane %v361_v35, %v2246_v62 }
  0xca   :  { %v2188_v40 = vpop.xlane.xlu0 %254  ;;  %v382_v20 = vmul.f32 0.00390625, %v2186_v39  ;;  %v639_v31 = vsel %vm515_vm4, %v638_v26, %v634_v28 }
  0xcb   :  { %v375_v2 = vmul.f32 0.00390625, %v2188_v40  ;;  %v605_v40 = vsel %vm522_vm5, %v604_v27, %v600_v38 }
  0xcd   :  { %v2190_v41 = vpop.xlane.xlu1 %296  ;;  %v672_v10 = vrot.slane %v375_v2, %v2220_v0 }
  0xce   :  { %v2192_v42 = vpop.xlane.xlu0 %293  ;;  %v389_v25 = vmul.f32 0.00390625, %v2190_v41 }
  0xcf   :  { %v388_v6 = vmul.f32 0.00390625, %v2192_v42 }
  0xd0   :  { %v740_v11 = vrot.slane %v389_v25, %v2212_v58 }
  0xd1   :  { %v2194_v43 = vpop.xlane.xlu1 %194 }
  0xd2   :  { %v2196_v44 = vpop.xlane.xlu0 %170  ;;  %v355_v18 = vmul.f32 0.00390625, %v2194_v43 }
  0xd3   :  { %v347_v48 = vmul.f32 0.00390625, %v2196_v44  ;;  %v571_v44 = vsel %vm529_vm6, %v570_v16, %v566_v55 }
  0xd4   :  { %v575_v30 = vrot.slane %v355_v18, %v2252_v21  ;;  %v673_v18 = vsel %vm508_vm3, %v672_v10, %v668_v57 }
  0xd5   :  { %v2198_v46 = vpop.xlane.xlu1 %236  ;;  %v535_v39 = vrot.slane %v347_v48, %v2252_v21 }
  0xd6   :  { %v2200_v47 = vpop.xlane.xlu0 %215  ;;  %v369_v41 = vmul.f32 0.00390625, %v2198_v46  ;;  %v736_v46 = vrot.slane %v388_v6, %v2209_v56 }
  0xd7   :  { %v362_v43 = vmul.f32 0.00390625, %v2200_v47  ;;  %v537_v13 = vsel %vm536_vm7, %v535_v39, %v530_v5 }
  0xd9   :  { %v2204_v52 = vpop.xlane.xlu1 %278  ;;  %v609_v33 = vrot.slane %v362_v43, %v2249_v63 }
  0xda   :  { %v2206_v54 = vpop.xlane.xlu0 %257  ;;  %v383_v32 = vmul.f32 0.00390625, %v2204_v52  ;;  %v576_v52 = vsel %vm536_vm7, %v575_v30, %v571_v44 }
  0xdb   :  { %v376_v34 = vmul.f32 0.00390625, %v2206_v54  ;;  %v610_v16 = vsel %vm529_vm6, %v609_v33, %v605_v40 }
  0xdc   :  { %v711_v36 = vrot.slane %v383_v32, %v2220_v0 }
  0xdd   :  { %v2217_v60 = vpop.xlane.xlu1 %317  ;;  %v677_v38 = vrot.slane %v376_v34, %v2225_v4 }
  0xde   :  { %v2222_v1 = vpop.xlane.xlu0 %299  ;;  %v396_v14 = vmul.f32 0.00390625, %v2217_v60  ;;  %v741_v60 = vsel %vm494_vm1, %v740_v11, %v736_v46 }
  0xdf   :  { %v390_v42 = vmul.f32 0.00390625, %v2222_v1  ;;  %v643_v1 = vrot.slane %v369_v41, %v2246_v62 }
  0xe0   :  { %v775_v43 = vrot.slane %v396_v14, %v2209_v56 }
  0xe1   :  { %v2228_v45 = vpop.xlane.xlu1 %218  ;;  %v745_v8 = vrot.slane %v390_v42, %v2215_v59 }
  0xe2   :  { %v2234_v15 = vpop.xlane.xlu0 %320  ;;  %v363_v29 = vmul.f32 0.00390625, %v2228_v45  ;;  %v706_v45 = vrot.slane %v382_v20, %v2215_v59  ;;  %v644_v20 = vsel %vm522_vm5, %v643_v1, %v639_v31 }
  0xe3   :  { %v397_v12 = vmul.f32 0.00390625, %v2234_v15  ;;  %v746_v44 = vsel %vm501_vm2, %v745_v8, %v741_v60 }
  0xe4   :  { %v614_v35 = vrot.slane %v363_v29, %v2252_v21  ;;  %v707_v15 = vsel %vm501_vm2, %v706_v45, %v702_v61 }
  0xe5   :  { %v2254_v22 = vpop.xlane.xlu1 %260  ;;  %v779_v48 = vrot.slane %v397_v12, %v2212_v58  ;;  %v712_v57 = vsel %vm508_vm3, %v711_v36, %v707_v15 }
  0xe6   :  { %v2260_v19 = vpop.xlane.xlu0 %239  ;;  %v377_v23 = vmul.f32 0.00390625, %v2254_v22  ;;  %v615_v22 = vsel %vm536_vm7, %v614_v35, %v610_v16 }
  0xe7   :  { %v370_v51 = vmul.f32 0.00390625, %v2260_v19  ;;  %v812_v19 = vsel %vm811_vm8, %v576_v52, %v537_v13  ;;  %v780_v29 = vsel %vm494_vm1, %v779_v48, %v775_v43  ;;  %vm907_vm1 = vcmask 31744  }
  0xe8   :  { %v682_v27 = vrot.slane %v377_v23, %v2246_v62  ;;  %v814_v2 = vsel %vm813_vm9, %v615_v22, %v812_v19 }
  0xe9   :  { %v2274_v17 = vpop.xlane.xlu1 %302  ;;  %v648_v58 = vrot.slane %v370_v51, %v2249_v63 }
  0xea   :  { %v2280_v24 = vpop.xlane.xlu0 %281  ;;  %v391_v55 = vmul.f32 0.00390625, %v2274_v17  ;;  %v678_v17 = vsel %vm515_vm4, %v677_v38, %v673_v18 }
  0xeb   :  { %v384_v28 = vmul.f32 0.00390625, %v2280_v24  ;;  %v683_v56 = vsel %vm522_vm5, %v682_v27, %v678_v17 }
  0xec   :  { %v750_v24 = vrot.slane %v391_v55, %v2220_v0 }
  0xed   :  { %v2294_v7 = vpop.xlane.xlu1 %242  ;;  %v716_v39 = vrot.slane %v384_v28, %v2225_v4 }
  0xee   :  { %v2300_v9 = vpop.xlane.xlu0 %323  ;;  %v371_v25 = vmul.f32 0.00390625, %v2294_v7  ;;  %v649_v7 = vsel %vm529_vm6, %v648_v58, %v644_v20  ;;  %v751_v10 = vsel %vm508_vm3, %v750_v24, %v746_v44 }
  0xef   :  { %v398_v5 = vmul.f32 0.00390625, %v2300_v9  ;;  %v717_v12 = vsel %vm515_vm4, %v716_v39, %v712_v57 }
  0xf0   :  { %v653_v9 = vrot.slane %v371_v25, %v2252_v21 }
  0xf1   :  { %v2314_v37 = vpop.xlane.xlu1 %284  ;;  %v784_v11 = vrot.slane %v398_v5, %v2215_v59 }
  0xf2   :  { %v2320_v53 = vpop.xlane.xlu0 %263  ;;  %v385_v6 = vmul.f32 0.00390625, %v2314_v37  ;;  %v654_v1 = vsel %vm536_vm7, %v653_v9, %v649_v7 }
  0xf3   :  { %v378_v31 = vmul.f32 0.00390625, %v2320_v53  ;;  %v785_v15 = vsel %vm501_vm2, %v784_v11, %v780_v29  ;;  %v816_v43 = vsel %vm815_vm10, %v654_v1, %v814_v2 }
  0xf4   :  { %v721_v53 = vrot.slane %v385_v6, %v2246_v62  ;;  %v1531_v6 = vld [vmem:[%s3235_s2] ss:$0 sm:$0xff] }
  0xf5   :  { %v2334_v3 = vpop.xlane.xlu1 %326 }
  0xf6   :  { %v306_v47 = vpop.xlane.xlu0 %305  ;;  %v399_v37 = vmul.f32 0.00390625, %v2334_v3  ;;  %v722_v16 = vsel %vm522_vm5, %v721_v53, %v717_v12  ;;  %v1063_v53 = vsub.s32 2, %v2202_v49 }
  0xf7   :  { %v392_v40 = vmul.f32 0.00390625, %v306_v47 }
  0xf8   :  { %v789_v36 = vrot.slane %v399_v37, %v2220_v0  ;;  %v993_v37 = vsub.s32 0, %v2202_v49 }
  0xf9   :  { %v288_v50 = vpop.xlane.xlu1 %287  ;;  %v755_v46 = vrot.slane %v392_v40, %v2225_v4  ;;  %v1533_v40 = vld [vmem:[%s3236_s4] ss:$0 sm:$0xff] }
  0xfa   :  { %v267_v54 = vpop.xlane.xlu0 %266  ;;  %v386_v32 = vmul.f32 0.00390625, %v288_v50  ;;  %v687_v50 = vrot.slane %v378_v31, %v2249_v63 }
  0xfb   :  { %v379_v45 = vmul.f32 0.00390625, %v267_v54  ;;  %v756_v48 = vsel %vm515_vm4, %v755_v46, %v751_v10  ;;  %v1028_v10 = vsub.s32 1, %v2202_v49 }
  0xfc   :  { %v726_v13 = vrot.slane %v386_v32, %v2249_v63  ;;  %v688_v22 = vsel %vm529_vm6, %v687_v50, %v683_v56  ;;  %v1133_v50 = vsub.s32 4, %v2202_v49 }
  0xfd   :  { %v330_v26 = vpop.xlane.xlu1 %329  ;;  %v692_v23 = vrot.slane %v379_v45, %v2252_v21 }
  0xfe   :  { %v309_v61 = vpop.xlane.xlu0 %308  ;;  %v400_v47 = vmul.f32 0.00390625, %v330_v26  ;;  %v727_v60 = vsel %vm529_vm6, %v726_v13, %v722_v16  ;;  %v1203_v13 = vsub.s32 6, %v2202_v49  ;;  %v1580_v16 = vld [vmem:[%s3232_s0] sm:$0xff] }
  0xff   :  { %v393_v33 = vmul.f32 0.00390625, %v309_v61  ;;  %v693_v19 = vsel %vm536_vm7, %v692_v23, %v688_v22 }
 0x100   :  { %v794_v38 = vrot.slane %v400_v47, %v2225_v4  ;;  %v790_v4 = vsel %vm508_vm3, %v789_v36, %v785_v15  ;;  %v818_v44 = vsel %vm817_vm11, %v693_v19, %v816_v43  ;;  %v1584_v19 = vld [vmem:[%s3232_s0 + $0x40] sm:$0xff] }
 0x101   :  { %v312_v30 = vpop.xlane.xlu1 %311  ;;  %v760_v54 = vrot.slane %v393_v33, %v2246_v62 }
 0x102   :  { %v291_v41 = vpop.xlane.xlu0 %290  ;;  %v394_v34 = vmul.f32 0.00390625, %v312_v30 }
 0x103   :  { %v387_v42 = vmul.f32 0.00390625, %v291_v41  ;;  %v761_v27 = vsel %vm522_vm5, %v760_v54, %v756_v48  ;;  %v1238_v54 = vsub.s32 7, %v2202_v49 }
 0x104   :  { %v765_v14 = vrot.slane %v394_v34, %v2249_v63 }
 0x105   :  { %v315_v35 = vpop.xlane.xlu1 %314  ;;  %v731_v51 = vrot.slane %v387_v42, %v2252_v21 }
 0x106   :  { %v395_v52 = vmul.f32 0.00390625, %v315_v35  ;;  %v333_v3 = vpop.xlane.xlu0 %332  ;;  %v766_v61 = vsel %vm529_vm6, %v765_v14, %v761_v27  ;;  %v1098_v35 = vsub.s32 3, %v2202_v49  ;;  %v1578_v14 = vld [vmem:[%s3232_s0 + $0x10] sm:$0xff] }
 0x107   :  { %v401_v59 = vmul.f32 0.00390625, %v333_v3  ;;  %v732_v20 = vsel %vm536_vm7, %v731_v51, %v727_v60 }
 0x108   :  { %v770_v8 = vrot.slane %v395_v52, %v2252_v21  ;;  %v820_v24 = vsel %vm819_vm12, %v732_v20, %v818_v44  ;;  %v1168_v52 = vsub.s32 5, %v2202_v49  ;;  %v1579_v49 = vld [vmem:[%s3232_s0 + $0x18] sm:$0xff] }
 0x109   :  { %v339_v18 = vpop.xlane.xlu1 %338  ;;  %v799_v55 = vrot.slane %v401_v59, %v2246_v62  ;;  %v795_v62 = vsel %vm515_vm4, %v794_v38, %v790_v4 }
 0x10a   :  { %v336_v0 = vpop.xlane.xlu0 %335  ;;  %v403_v26 = vmul.f32 0.00390625, %v339_v18  ;;  %v771_v58 = vsel %vm536_vm7, %v770_v8, %v766_v61  ;;  %v1581_v8 = vld [vmem:[%s3232_s0 + $0x8] sm:$0xff] }
 0x10b   :  { %v402_v28 = vmul.f32 0.00390625, %v336_v0  ;;  %v800_v25 = vsel %vm522_vm5, %v799_v55, %v795_v62  ;;  %v822_v2 = vsel %vm821_vm13, %v771_v58, %v820_v24  ;;  %v1582_v55 = vld [vmem:[%s3232_s0 + $0x20] sm:$0xff]  ;;  %v1587_v62 = vld [vmem:[%s3232_s0 + $0x38] sm:$0xff] }
 0x10c   :  { %v809_v57 = vrot.slane %v403_v26, %v2252_v21  ;;  %v1583_v26 = vld [vmem:[%s3232_s0 + $0x28] sm:$0xff] }
 0x10d   :  { %v804_v17 = vrot.slane %v402_v28, %v2249_v63  ;;  %v899_v63 = vld [vmem:[%s3234_s3] sm:$0xf]  ;;  %v1585_v28 = vld [vmem:[%s3232_s0 + $0x48] sm:$0xff] }
 0x10e   :  { %1568 = vmatpush3.msk.msra.mxu1 %vm911_vm0, %v899_v63  ;;  %v1591_v63 = vld [vmem:[%s3232_s0 + $0x58] sm:$0xff] }
 0x10f   :  { %v805_v29 = vsel %vm529_vm6, %v804_v17, %v800_v25  ;;  %v1588_v17 = vld [vmem:[%s3232_s0 + $0x60] sm:$0xff]  ;;  %v1589_v25 = vld [vmem:[%s3232_s0 + $0x68] sm:$0xff] }
 0x110   :  { %v810_v21 = vsel %vm536_vm7, %v809_v57, %v805_v29  ;;  %v1586_v57 = vld [vmem:[%s3232_s0 + $0x30] sm:$0xff] }
 0x111   :  { %v824_v5 = vsel %vm823_vm14, %v810_v21, %v822_v2  ;;  %v1590_v2 = vld [vmem:[%s3232_s0 + $0x50] sm:$0xff] }
 0x112   :  { %1565 = vmatmul.mubr.msk.f32.vlgmr.msra.gmra.mxu0 %vm825_vm15, %v824_v5 }
 0x1d2   :  { %v894_v30 = vpop.f32.mrf.mxu0 }
 0x1d3   :  { %v895_v56 = vadd.f32 %v1531_v6, %v894_v30  ;;  %v1592_v30 = vld [vmem:[%s3232_s0 + $0x80] sm:$0xff] }
 0x1d4   :  { %v1566_v39 = vpop.f32.mrf.mxu0 }
 0x1d5   :  { %v898_v31 = vmax.f32 %v895_v56, 0.0  ;;  %v1593_v39 = vld [vmem:[%s3232_s0 + $0x88] sm:$0xff] }
 0x1d7   :  { %1570 = vmatmul.mubr.msk.f32.vlgmr.msra.gmra.mxu1 %vm907_vm1, %v898_v31 }
 0x297   :  { %v981_v41 = vpop.f32.mrf.mxu1 }
 0x298   :  { %v982_v7 = vadd.f32 %v1533_v40, %v981_v41 }
 0x299   :  { %v1571_v32 = vpop.f32.mrf.mxu1 }
 0x29a   :  { %v1536_v45 = vmul.f32 -1.442695, %v982_v7  ;;  %v1594_v7 = vld [vmem:[%s3232_s0 + $0x70] sm:$0xff] }
 0x29c   :  { %1574 = vpow2.f32 %v1536_v45  ;;  %v1595_v45 = vld [vmem:[%s3232_s0 + $0x78] sm:$0xff] }
 0x2a9   :  { %v1575_v33 = vpop.eup %1574 }
 0x2aa   :  { %v988_v9 = vadd.f32 1.0, %v1575_v33 }
 0x2ac   :  { %1576 = vrcp.f32 %v988_v9  ;;  %v1596_v9 = vld [vmem:[%s3232_s0 + $0xa0] sm:$0xff] }
 0x2b9   :  { %v2437_v34 = vpop.eup %1576 }
 0x2ba   :  { %v994_v42 = vrot.slane %v2437_v34, %v993_v37  ;;  %v1029_v11 = vrot.slane %v2437_v34, %v1028_v10  ;;  %v1064_v47 = vrot.slane %v2437_v34, %v1063_v53  ;;  %v1099_v12 = vrot.slane %v2437_v34, %v1098_v35  ;;  %v1598_v53 = vld [vmem:[%s3232_s0 + $0x90] sm:$0xff]  ;;  %v1599_v35 = vld [vmem:[%s3232_s0 + $0x98] sm:$0xff] }
 0x2bb   :  { %v1134_v46 = vrot.slane %v2437_v34, %v1133_v50  ;;  %v1169_v3 = vrot.slane %v2437_v34, %v1168_v52  ;;  %v1204_v23 = vrot.slane %v2437_v34, %v1203_v13  ;;  %v2454_v59 = vrot.slane %v2437_v34, %v1238_v54  ;;  %v1597_v34 = vld [vmem:[%s3232_s0 + $0xa8] sm:$0xff]  ;;  %v1600_v50 = vld [vmem:[%s3232_s0 + $0xc0] sm:$0xff]  ;;  %v1602_v54 = vld [vmem:[%s3232_s0 + $0xb0] sm:$0xff] }
 0x2bc   :  { %1000 = vbcast.lane.b32.xlu1 %v994_v42, 264  ;;  %996 = vbcast.lane.b32.xlu0 %v994_v42, 256  ;;  %v1601_v52 = vld [vmem:[%s3232_s0 + $0xc8] sm:$0xff] }
 0x2c0   :  { %1004 = vbcast.lane.b32.xlu1 %v994_v42, 272  ;;  %1012 = vbcast.lane.b32.xlu0 %v994_v42, 288 }
 0x2c4   :  { %1008 = vbcast.lane.b32.xlu1 %v994_v42, 280  ;;  %1020 = vbcast.lane.b32.xlu0 %v994_v42, 304 }
 0x2c8   :  { %1016 = vbcast.lane.b32.xlu1 %v994_v42, 296  ;;  %1031 = vbcast.lane.b32.xlu0 %v1029_v11, 256 }
 0x2cc   :  { %1024 = vbcast.lane.b32.xlu1 %v994_v42, 312  ;;  %1039 = vbcast.lane.b32.xlu0 %v1029_v11, 272 }
 0x2d0   :  { %1035 = vbcast.lane.b32.xlu1 %v1029_v11, 264  ;;  %1047 = vbcast.lane.b32.xlu0 %v1029_v11, 288 }
 0x2d4   :  { %1043 = vbcast.lane.b32.xlu1 %v1029_v11, 280  ;;  %1055 = vbcast.lane.b32.xlu0 %v1029_v11, 304 }
 0x2d8   :  { %1051 = vbcast.lane.b32.xlu1 %v1029_v11, 296  ;;  %1066 = vbcast.lane.b32.xlu0 %v1064_v47, 256 }
 0x2dc   :  { %1059 = vbcast.lane.b32.xlu1 %v1029_v11, 312  ;;  %1074 = vbcast.lane.b32.xlu0 %v1064_v47, 272 }
 0x2e0   :  { %1070 = vbcast.lane.b32.xlu1 %v1064_v47, 264  ;;  %1082 = vbcast.lane.b32.xlu0 %v1064_v47, 288 }
 0x2e4   :  { %1078 = vbcast.lane.b32.xlu1 %v1064_v47, 280  ;;  %1090 = vbcast.lane.b32.xlu0 %v1064_v47, 304 }
 0x2e8   :  { %1086 = vbcast.lane.b32.xlu1 %v1064_v47, 296  ;;  %1101 = vbcast.lane.b32.xlu0 %v1099_v12, 256 }
 0x2ec   :  { %1094 = vbcast.lane.b32.xlu1 %v1064_v47, 312  ;;  %1109 = vbcast.lane.b32.xlu0 %v1099_v12, 272 }
 0x2f0   :  { %1105 = vbcast.lane.b32.xlu1 %v1099_v12, 264  ;;  %1117 = vbcast.lane.b32.xlu0 %v1099_v12, 288 }
 0x2f4   :  { %1113 = vbcast.lane.b32.xlu1 %v1099_v12, 280  ;;  %1125 = vbcast.lane.b32.xlu0 %v1099_v12, 304 }
 0x2f8   :  { %1121 = vbcast.lane.b32.xlu1 %v1099_v12, 296  ;;  %1136 = vbcast.lane.b32.xlu0 %v1134_v46, 256 }
 0x2fc   :  { %1129 = vbcast.lane.b32.xlu1 %v1099_v12, 312  ;;  %1144 = vbcast.lane.b32.xlu0 %v1134_v46, 272 }
 0x300   :  { %1140 = vbcast.lane.b32.xlu1 %v1134_v46, 264  ;;  %1152 = vbcast.lane.b32.xlu0 %v1134_v46, 288 }
 0x304   :  { %1148 = vbcast.lane.b32.xlu1 %v1134_v46, 280  ;;  %1160 = vbcast.lane.b32.xlu0 %v1134_v46, 304 }
 0x308   :  { %1156 = vbcast.lane.b32.xlu1 %v1134_v46, 296  ;;  %1171 = vbcast.lane.b32.xlu0 %v1169_v3, 256 }
 0x30c   :  { %1164 = vbcast.lane.b32.xlu1 %v1134_v46, 312  ;;  %1179 = vbcast.lane.b32.xlu0 %v1169_v3, 272 }
 0x310   :  { %1175 = vbcast.lane.b32.xlu1 %v1169_v3, 264  ;;  %1187 = vbcast.lane.b32.xlu0 %v1169_v3, 288 }
 0x314   :  { %1183 = vbcast.lane.b32.xlu1 %v1169_v3, 280  ;;  %1195 = vbcast.lane.b32.xlu0 %v1169_v3, 304 }
 0x318   :  { %1191 = vbcast.lane.b32.xlu1 %v1169_v3, 296  ;;  %1206 = vbcast.lane.b32.xlu0 %v1204_v23, 256 }
 0x31c   :  { %1199 = vbcast.lane.b32.xlu1 %v1169_v3, 312  ;;  %1214 = vbcast.lane.b32.xlu0 %v1204_v23, 272 }
 0x320   :  { %1210 = vbcast.lane.b32.xlu1 %v1204_v23, 264  ;;  %1222 = vbcast.lane.b32.xlu0 %v1204_v23, 288 }
 0x324   :  { %1218 = vbcast.lane.b32.xlu1 %v1204_v23, 280  ;;  %1230 = vbcast.lane.b32.xlu0 %v1204_v23, 304 }
 0x328   :  { %1226 = vbcast.lane.b32.xlu1 %v1204_v23, 296  ;;  %1241 = vbcast.lane.b32.xlu0 %v2454_v59, 256 }
 0x32c   :  { %1234 = vbcast.lane.b32.xlu1 %v1204_v23, 312  ;;  %1249 = vbcast.lane.b32.xlu0 %v2454_v59, 272 }
 0x32e   :  { %v1001_v1 = vpop.permute.xlu1 %1000  ;;  %v997_v36 = vpop.permute.xlu0 %996 }
 0x32f   :  { %v1273_v51 = vmul.f32 %v1578_v14, %v1001_v1  ;;  %v1274_v15 = vmul.f32 %v1579_v49, %v1001_v1  ;;  %v1271_v38 = vmul.f32 %v1580_v16, %v997_v36  ;;  %v1272_v18 = vmul.f32 %v1581_v8, %v997_v36  ;;  %v1603_v1 = vld [vmem:[%s3232_s0 + $0xb8] sm:$0xff]  ;;  %v1604_v14 = vld [vmem:[%s3232_s0 + $0xe0] sm:$0xff]  ;;  %v1605_v49 = vld [vmem:[%s3232_s0 + $0xe8] sm:$0xff] }
 0x330   :  { %1245 = vbcast.lane.b32.xlu1 %v2454_v59, 264  ;;  %1257 = vbcast.lane.b32.xlu0 %v2454_v59, 288  ;;  %v1606_v8 = vld [vmem:[%s3232_s0 + $0xd0] sm:$0xff] }
 0x331   :  { %1401 = vst [vmem:[%s3237_s5 + $0x10] sm:$0xff] %v1273_v51  ;;  %1402 = vst [vmem:[%s3237_s5 + $0x18] sm:$0xff] %v1274_v15 }
 0x332   :  { %1399 = vst [vmem:[%s3237_s5] sm:$0xff] %v1271_v38  ;;  %1400 = vst [vmem:[%s3237_s5 + $0x8] sm:$0xff] %v1272_v18  ;;  %v1005_v22 = vpop.permute.xlu1 %1004  ;;  %v1013_v48 = vpop.permute.xlu0 %1012 }
 0x333   :  { %v1275_v0 = vmul.f32 %v1582_v55, %v1005_v22  ;;  %v1276_v60 = vmul.f32 %v1583_v26, %v1005_v22  ;;  %v1279_v27 = vmul.f32 %v1584_v19, %v1013_v48  ;;  %v1280_v4 = vmul.f32 %v1585_v28, %v1013_v48  ;;  %v1607_v22 = vld [vmem:[%s3232_s0 + $0xd8] sm:$0xff]  ;;  %v1608_v55 = vld [vmem:[%s3232_s0 + $0x100] sm:$0xff]  ;;  %v1609_v26 = vld [vmem:[%s3232_s0 + $0x108] sm:$0xff] }
 0x334   :  { %1253 = vbcast.lane.b32.xlu1 %v2454_v59, 280  ;;  %1265 = vbcast.lane.b32.xlu0 %v2454_v59, 304  ;;  %v1610_v28 = vld [vmem:[%s3232_s0 + $0xf0] sm:$0xff] }
 0x335   :  { %1403 = vst [vmem:[%s3237_s5 + $0x20] sm:$0xff] %v1275_v0  ;;  %1404 = vst [vmem:[%s3237_s5 + $0x28] sm:$0xff] %v1276_v60 }
 0x336   :  { %1407 = vst [vmem:[%s3237_s5 + $0x40] sm:$0xff] %v1279_v27  ;;  %1408 = vst [vmem:[%s3237_s5 + $0x48] sm:$0xff] %v1280_v4  ;;  %v1009_v61 = vpop.permute.xlu1 %1008  ;;  %v1021_v20 = vpop.permute.xlu0 %1020 }
 0x337   :  { %v1277_v43 = vmul.f32 %v1586_v57, %v1009_v61  ;;  %v1278_v58 = vmul.f32 %v1587_v62, %v1009_v61  ;;  %v1283_v44 = vmul.f32 %v1588_v17, %v1021_v20  ;;  %v1284_v29 = vmul.f32 %v1589_v25, %v1021_v20  ;;  %v1611_v61 = vld [vmem:[%s3232_s0 + $0xf8] sm:$0xff]  ;;  %v1612_v57 = vld [vmem:[%s3232_s0 + $0x120] sm:$0xff]  ;;  %v1613_v62 = vld [vmem:[%s3232_s0 + $0x128] sm:$0xff] }
 0x338   :  { %1261 = vbcast.lane.b32.xlu1 %v2454_v59, 296  ;;  %v1614_v25 = vld [vmem:[%s3232_s0 + $0x110] sm:$0xff] }
 0x339   :  { %1405 = vst [vmem:[%s3237_s5 + $0x30] sm:$0xff] %v1277_v43  ;;  %1406 = vst [vmem:[%s3237_s5 + $0x38] sm:$0xff] %v1278_v58 }
 0x33a   :  { %1411 = vst [vmem:[%s3237_s5 + $0x60] sm:$0xff] %v1283_v44  ;;  %1412 = vst [vmem:[%s3237_s5 + $0x68] sm:$0xff] %v1284_v29  ;;  %v1017_v24 = vpop.permute.xlu1 %1016  ;;  %v1032_v21 = vpop.permute.xlu0 %1031 }
 0x33b   :  { %v1281_v5 = vmul.f32 %v1590_v2, %v1017_v24  ;;  %v1282_v6 = vmul.f32 %v1591_v63, %v1017_v24  ;;  %v1287_v56 = vmul.f32 %v1592_v30, %v1032_v21  ;;  %v1288_v31 = vmul.f32 %v1593_v39, %v1032_v21  ;;  %v1615_v24 = vld [vmem:[%s3232_s0 + $0x118] sm:$0xff]  ;;  %v1616_v2 = vld [vmem:[%s3232_s0 + $0x140] sm:$0xff]  ;;  %v1617_v63 = vld [vmem:[%s3232_s0 + $0x148] sm:$0xff] }
 0x33c   :  { %1269 = vbcast.lane.b32.xlu1 %v2454_v59, 312  ;;  %v1618_v39 = vld [vmem:[%s3232_s0 + $0x130] sm:$0xff] }
 0x33d   :  { %1409 = vst [vmem:[%s3237_s5 + $0x50] sm:$0xff] %v1281_v5  ;;  %1410 = vst [vmem:[%s3237_s5 + $0x58] sm:$0xff] %v1282_v6 }
 0x33e   :  { %1415 = vst [vmem:[%s3237_s5 + $0x80] sm:$0xff] %v1287_v56  ;;  %1416 = vst [vmem:[%s3237_s5 + $0x88] sm:$0xff] %v1288_v31  ;;  %v1025_v40 = vpop.permute.xlu1 %1024  ;;  %v1040_v41 = vpop.permute.xlu0 %1039 }
 0x33f   :  { %v1285_v32 = vmul.f32 %v1594_v7, %v1025_v40  ;;  %v1286_v33 = vmul.f32 %v1595_v45, %v1025_v40  ;;  %v1291_v37 = vmul.f32 %v1596_v9, %v1040_v41  ;;  %v1292_v42 = vmul.f32 %v1597_v34, %v1040_v41  ;;  %v1619_v40 = vld [vmem:[%s3232_s0 + $0x138] sm:$0xff]  ;;  %v1620_v7 = vld [vmem:[%s3232_s0 + $0x160] sm:$0xff]  ;;  %v1621_v45 = vld [vmem:[%s3232_s0 + $0x168] sm:$0xff] }
 0x340   :  { %v1622_v34 = vld [vmem:[%s3232_s0 + $0x150] sm:$0xff] }
 0x341   :  { %1413 = vst [vmem:[%s3237_s5 + $0x70] sm:$0xff] %v1285_v32  ;;  %1414 = vst [vmem:[%s3237_s5 + $0x78] sm:$0xff] %v1286_v33 }
 0x342   :  { %1419 = vst [vmem:[%s3237_s5 + $0xa0] sm:$0xff] %v1291_v37  ;;  %1420 = vst [vmem:[%s3237_s5 + $0xa8] sm:$0xff] %v1292_v42  ;;  %v1036_v10 = vpop.permute.xlu1 %1035  ;;  %v1048_v11 = vpop.permute.xlu0 %1047 }
 0x343   :  { %v1289_v47 = vmul.f32 %v1598_v53, %v1036_v10  ;;  %v1290_v12 = vmul.f32 %v1599_v35, %v1036_v10  ;;  %v1295_v46 = vmul.f32 %v1600_v50, %v1048_v11  ;;  %v1296_v3 = vmul.f32 %v1601_v52, %v1048_v11  ;;  %v1623_v10 = vld [vmem:[%s3232_s0 + $0x158] sm:$0xff]  ;;  %v1624_v53 = vld [vmem:[%s3232_s0 + $0x180] sm:$0xff]  ;;  %v1625_v35 = vld [vmem:[%s3232_s0 + $0x188] sm:$0xff] }
 0x344   :  { %v1626_v52 = vld [vmem:[%s3232_s0 + $0x170] sm:$0xff] }
 0x345   :  { %1417 = vst [vmem:[%s3237_s5 + $0x90] sm:$0xff] %v1289_v47  ;;  %1418 = vst [vmem:[%s3237_s5 + $0x98] sm:$0xff] %v1290_v12 }
 0x346   :  { %1423 = vst [vmem:[%s3237_s5 + $0xc0] sm:$0xff] %v1295_v46  ;;  %1424 = vst [vmem:[%s3237_s5 + $0xc8] sm:$0xff] %v1296_v3  ;;  %v1044_v13 = vpop.permute.xlu1 %1043  ;;  %v1056_v23 = vpop.permute.xlu0 %1055 }
 0x347   :  { %v1293_v59 = vmul.f32 %v1602_v54, %v1044_v13  ;;  %v1294_v36 = vmul.f32 %v1603_v1, %v1044_v13  ;;  %v1299_v51 = vmul.f32 %v1604_v14, %v1056_v23  ;;  %v1300_v15 = vmul.f32 %v1605_v49, %v1056_v23  ;;  %v1627_v13 = vld [vmem:[%s3232_s0 + $0x178] sm:$0xff]  ;;  %v1628_v54 = vld [vmem:[%s3232_s0 + $0x1a0] sm:$0xff]  ;;  %v1629_v1 = vld [vmem:[%s3232_s0 + $0x1a8] sm:$0xff] }
 0x348   :  { %v1630_v49 = vld [vmem:[%s3232_s0 + $0x190] sm:$0xff] }
 0x349   :  { %1421 = vst [vmem:[%s3237_s5 + $0xb0] sm:$0xff] %v1293_v59  ;;  %1422 = vst [vmem:[%s3237_s5 + $0xb8] sm:$0xff] %v1294_v36 }
 0x34a   :  { %1427 = vst [vmem:[%s3237_s5 + $0xe0] sm:$0xff] %v1299_v51  ;;  %1428 = vst [vmem:[%s3237_s5 + $0xe8] sm:$0xff] %v1300_v15  ;;  %v1052_v16 = vpop.permute.xlu1 %1051  ;;  %v1067_v38 = vpop.permute.xlu0 %1066 }
 0x34b   :  { %v1297_v18 = vmul.f32 %v1606_v8, %v1052_v16  ;;  %v1298_v48 = vmul.f32 %v1607_v22, %v1052_v16  ;;  %v1303_v0 = vmul.f32 %v1608_v55, %v1067_v38  ;;  %v1304_v60 = vmul.f32 %v1609_v26, %v1067_v38  ;;  %v1631_v16 = vld [vmem:[%s3232_s0 + $0x198] sm:$0xff]  ;;  %v1632_v8 = vld [vmem:[%s3232_s0 + $0x1c0] sm:$0xff]  ;;  %v1633_v22 = vld [vmem:[%s3232_s0 + $0x1c8] sm:$0xff] }
 0x34c   :  { %v1634_v26 = vld [vmem:[%s3232_s0 + $0x1b0] sm:$0xff] }
 0x34d   :  { %1425 = vst [vmem:[%s3237_s5 + $0xd0] sm:$0xff] %v1297_v18  ;;  %1426 = vst [vmem:[%s3237_s5 + $0xd8] sm:$0xff] %v1298_v48 }
 0x34e   :  { %1431 = vst [vmem:[%s3237_s5 + $0x100] sm:$0xff] %v1303_v0  ;;  %1432 = vst [vmem:[%s3237_s5 + $0x108] sm:$0xff] %v1304_v60  ;;  %v1060_v19 = vpop.permute.xlu1 %1059  ;;  %v1075_v27 = vpop.permute.xlu0 %1074 }
 0x34f   :  { %v1301_v4 = vmul.f32 %v1610_v28, %v1060_v19  ;;  %v1302_v20 = vmul.f32 %v1611_v61, %v1060_v19  ;;  %v1307_v43 = vmul.f32 %v1612_v57, %v1075_v27  ;;  %v1308_v58 = vmul.f32 %v1613_v62, %v1075_v27  ;;  %v1635_v19 = vld [vmem:[%s3232_s0 + $0x1b8] sm:$0xff]  ;;  %v1636_v28 = vld [vmem:[%s3232_s0 + $0x1e0] sm:$0xff]  ;;  %v1637_v61 = vld [vmem:[%s3232_s0 + $0x1e8] sm:$0xff] }
 0x350   :  { %v1638_v62 = vld [vmem:[%s3232_s0 + $0x1d0] sm:$0xff] }
 0x351   :  { %1429 = vst [vmem:[%s3237_s5 + $0xf0] sm:$0xff] %v1301_v4  ;;  %1430 = vst [vmem:[%s3237_s5 + $0xf8] sm:$0xff] %v1302_v20 }
 0x352   :  { %1435 = vst [vmem:[%s3237_s5 + $0x120] sm:$0xff] %v1307_v43  ;;  %1436 = vst [vmem:[%s3237_s5 + $0x128] sm:$0xff] %v1308_v58  ;;  %v1071_v17 = vpop.permute.xlu1 %1070  ;;  %v1083_v44 = vpop.permute.xlu0 %1082 }
 0x353   :  { %v1305_v29 = vmul.f32 %v1614_v25, %v1071_v17  ;;  %v1306_v21 = vmul.f32 %v1615_v24, %v1071_v17  ;;  %v1311_v5 = vmul.f32 %v1616_v2, %v1083_v44  ;;  %v1312_v6 = vmul.f32 %v1617_v63, %v1083_v44  ;;  %v1639_v17 = vld [vmem:[%s3232_s0 + $0x1d8] sm:$0xff]  ;;  %v1640_v25 = vld [vmem:[%s3232_s0 + $0x200] sm:$0xff]  ;;  %v1641_v24 = vld [vmem:[%s3232_s0 + $0x208] sm:$0xff] }
 0x354   :  { %v1642_v63 = vld [vmem:[%s3232_s0 + $0x1f0] sm:$0xff] }
 0x355   :  { %1433 = vst [vmem:[%s3237_s5 + $0x110] sm:$0xff] %v1305_v29  ;;  %1434 = vst [vmem:[%s3237_s5 + $0x118] sm:$0xff] %v1306_v21 }
 0x356   :  { %1439 = vst [vmem:[%s3237_s5 + $0x140] sm:$0xff] %v1311_v5  ;;  %1440 = vst [vmem:[%s3237_s5 + $0x148] sm:$0xff] %v1312_v6  ;;  %v1079_v30 = vpop.permute.xlu1 %1078  ;;  %v1091_v56 = vpop.permute.xlu0 %1090 }
 0x357   :  { %v1309_v31 = vmul.f32 %v1618_v39, %v1079_v30  ;;  %v1310_v41 = vmul.f32 %v1619_v40, %v1079_v30  ;;  %v1315_v32 = vmul.f32 %v1620_v7, %v1091_v56  ;;  %v1316_v33 = vmul.f32 %v1621_v45, %v1091_v56  ;;  %v1643_v30 = vld [vmem:[%s3232_s0 + $0x1f8] sm:$0xff]  ;;  %v1644_v39 = vld [vmem:[%s3232_s0 + $0x220] sm:$0xff]  ;;  %v1645_v40 = vld [vmem:[%s3232_s0 + $0x228] sm:$0xff] }
 0x358   :  { %v1646_v45 = vld [vmem:[%s3232_s0 + $0x210] sm:$0xff] }
 0x359   :  { %1437 = vst [vmem:[%s3237_s5 + $0x130] sm:$0xff] %v1309_v31  ;;  %1438 = vst [vmem:[%s3237_s5 + $0x138] sm:$0xff] %v1310_v41 }
 0x35a   :  { %1443 = vst [vmem:[%s3237_s5 + $0x160] sm:$0xff] %v1315_v32  ;;  %1444 = vst [vmem:[%s3237_s5 + $0x168] sm:$0xff] %v1316_v33  ;;  %v1087_v9 = vpop.permute.xlu1 %1086  ;;  %v1102_v37 = vpop.permute.xlu0 %1101 }
 0x35b   :  { %v1313_v42 = vmul.f32 %v1622_v34, %v1087_v9  ;;  %v1314_v11 = vmul.f32 %v1623_v10, %v1087_v9  ;;  %v1319_v47 = vmul.f32 %v1624_v53, %v1102_v37  ;;  %v1320_v12 = vmul.f32 %v1625_v35, %v1102_v37  ;;  %v1647_v9 = vld [vmem:[%s3232_s0 + $0x218] sm:$0xff]  ;;  %v1648_v34 = vld [vmem:[%s3232_s0 + $0x240] sm:$0xff]  ;;  %v1649_v10 = vld [vmem:[%s3232_s0 + $0x248] sm:$0xff] }
 0x35c   :  { %v1650_v35 = vld [vmem:[%s3232_s0 + $0x230] sm:$0xff] }
 0x35d   :  { %1441 = vst [vmem:[%s3237_s5 + $0x150] sm:$0xff] %v1313_v42  ;;  %1442 = vst [vmem:[%s3237_s5 + $0x158] sm:$0xff] %v1314_v11 }
 0x35e   :  { %1447 = vst [vmem:[%s3237_s5 + $0x180] sm:$0xff] %v1319_v47  ;;  %1448 = vst [vmem:[%s3237_s5 + $0x188] sm:$0xff] %v1320_v12  ;;  %v1095_v50 = vpop.permute.xlu1 %1094  ;;  %v1110_v46 = vpop.permute.xlu0 %1109 }
 0x35f   :  { %v1317_v3 = vmul.f32 %v1626_v52, %v1095_v50  ;;  %v1318_v23 = vmul.f32 %v1627_v13, %v1095_v50  ;;  %v1323_v59 = vmul.f32 %v1628_v54, %v1110_v46  ;;  %v1324_v36 = vmul.f32 %v1629_v1, %v1110_v46  ;;  %v1651_v50 = vld [vmem:[%s3232_s0 + $0x238] sm:$0xff]  ;;  %v1652_v52 = vld [vmem:[%s3232_s0 + $0x260] sm:$0xff]  ;;  %v1653_v13 = vld [vmem:[%s3232_s0 + $0x268] sm:$0xff] }
 0x360   :  { %v1654_v1 = vld [vmem:[%s3232_s0 + $0x250] sm:$0xff] }
 0x361   :  { %1445 = vst [vmem:[%s3237_s5 + $0x170] sm:$0xff] %v1317_v3  ;;  %1446 = vst [vmem:[%s3237_s5 + $0x178] sm:$0xff] %v1318_v23 }
 0x362   :  { %1451 = vst [vmem:[%s3237_s5 + $0x1a0] sm:$0xff] %v1323_v59  ;;  %1452 = vst [vmem:[%s3237_s5 + $0x1a8] sm:$0xff] %v1324_v36  ;;  %v1106_v14 = vpop.permute.xlu1 %1105  ;;  %v1118_v51 = vpop.permute.xlu0 %1117 }
 0x363   :  { %v1321_v15 = vmul.f32 %v1630_v49, %v1106_v14  ;;  %v1322_v38 = vmul.f32 %v1631_v16, %v1106_v14  ;;  %v1327_v18 = vmul.f32 %v1632_v8, %v1118_v51  ;;  %v1328_v48 = vmul.f32 %v1633_v22, %v1118_v51  ;;  %v1655_v14 = vld [vmem:[%s3232_s0 + $0x258] sm:$0xff]  ;;  %v1656_v49 = vld [vmem:[%s3232_s0 + $0x280] sm:$0xff]  ;;  %v1657_v16 = vld [vmem:[%s3232_s0 + $0x288] sm:$0xff] }
 0x364   :  { %v1658_v22 = vld [vmem:[%s3232_s0 + $0x270] sm:$0xff] }
 0x365   :  { %1449 = vst [vmem:[%s3237_s5 + $0x190] sm:$0xff] %v1321_v15  ;;  %1450 = vst [vmem:[%s3237_s5 + $0x198] sm:$0xff] %v1322_v38 }
 0x366   :  { %1455 = vst [vmem:[%s3237_s5 + $0x1c0] sm:$0xff] %v1327_v18  ;;  %1456 = vst [vmem:[%s3237_s5 + $0x1c8] sm:$0xff] %v1328_v48  ;;  %v1114_v55 = vpop.permute.xlu1 %1113  ;;  %v1126_v0 = vpop.permute.xlu0 %1125 }
 0x367   :  { %v1325_v60 = vmul.f32 %v1634_v26, %v1114_v55  ;;  %v1326_v27 = vmul.f32 %v1635_v19, %v1114_v55  ;;  %v1331_v4 = vmul.f32 %v1636_v28, %v1126_v0  ;;  %v1332_v20 = vmul.f32 %v1637_v61, %v1126_v0  ;;  %v1659_v55 = vld [vmem:[%s3232_s0 + $0x278] sm:$0xff]  ;;  %v1660_v26 = vld [vmem:[%s3232_s0 + $0x2a0] sm:$0xff]  ;;  %v1661_v19 = vld [vmem:[%s3232_s0 + $0x2a8] sm:$0xff] }
 0x368   :  { %v1662_v61 = vld [vmem:[%s3232_s0 + $0x290] sm:$0xff] }
 0x369   :  { %1453 = vst [vmem:[%s3237_s5 + $0x1b0] sm:$0xff] %v1325_v60  ;;  %1454 = vst [vmem:[%s3237_s5 + $0x1b8] sm:$0xff] %v1326_v27 }
 0x36a   :  { %1459 = vst [vmem:[%s3237_s5 + $0x1e0] sm:$0xff] %v1331_v4  ;;  %1460 = vst [vmem:[%s3237_s5 + $0x1e8] sm:$0xff] %v1332_v20  ;;  %v1122_v57 = vpop.permute.xlu1 %1121  ;;  %v1137_v43 = vpop.permute.xlu0 %1136 }
 0x36b   :  { %v1329_v58 = vmul.f32 %v1638_v62, %v1122_v57  ;;  %v1330_v44 = vmul.f32 %v1639_v17, %v1122_v57  ;;  %v1335_v29 = vmul.f32 %v1640_v25, %v1137_v43  ;;  %v1336_v21 = vmul.f32 %v1641_v24, %v1137_v43  ;;  %v1663_v57 = vld [vmem:[%s3232_s0 + $0x298] sm:$0xff]  ;;  %v1664_v62 = vld [vmem:[%s3232_s0 + $0x2c0] sm:$0xff]  ;;  %v1665_v17 = vld [vmem:[%s3232_s0 + $0x2c8] sm:$0xff] }
 0x36c   :  { %v1666_v24 = vld [vmem:[%s3232_s0 + $0x2b0] sm:$0xff] }
 0x36d   :  { %1457 = vst [vmem:[%s3237_s5 + $0x1d0] sm:$0xff] %v1329_v58  ;;  %1458 = vst [vmem:[%s3237_s5 + $0x1d8] sm:$0xff] %v1330_v44 }
 0x36e   :  { %1463 = vst [vmem:[%s3237_s5 + $0x200] sm:$0xff] %v1335_v29  ;;  %1464 = vst [vmem:[%s3237_s5 + $0x208] sm:$0xff] %v1336_v21  ;;  %v1130_v2 = vpop.permute.xlu1 %1129  ;;  %v1145_v5 = vpop.permute.xlu0 %1144 }
 0x36f   :  { %v1333_v6 = vmul.f32 %v1642_v63, %v1130_v2  ;;  %v1334_v56 = vmul.f32 %v1643_v30, %v1130_v2  ;;  %v1339_v31 = vmul.f32 %v1644_v39, %v1145_v5  ;;  %v1340_v41 = vmul.f32 %v1645_v40, %v1145_v5  ;;  %v1667_v2 = vld [vmem:[%s3232_s0 + $0x2b8] sm:$0xff]  ;;  %v1668_v63 = vld [vmem:[%s3232_s0 + $0x2e0] sm:$0xff]  ;;  %v1669_v30 = vld [vmem:[%s3232_s0 + $0x2e8] sm:$0xff] }
 0x370   :  { %v1670_v40 = vld [vmem:[%s3232_s0 + $0x2d0] sm:$0xff] }
 0x371   :  { %1461 = vst [vmem:[%s3237_s5 + $0x1f0] sm:$0xff] %v1333_v6  ;;  %1462 = vst [vmem:[%s3237_s5 + $0x1f8] sm:$0xff] %v1334_v56 }
 0x372   :  { %1467 = vst [vmem:[%s3237_s5 + $0x220] sm:$0xff] %v1339_v31  ;;  %1468 = vst [vmem:[%s3237_s5 + $0x228] sm:$0xff] %v1340_v41  ;;  %v1141_v7 = vpop.permute.xlu1 %1140  ;;  %v1153_v32 = vpop.permute.xlu0 %1152 }
 0x373   :  { %v1337_v33 = vmul.f32 %v1646_v45, %v1141_v7  ;;  %v1338_v37 = vmul.f32 %v1647_v9, %v1141_v7  ;;  %v1343_v42 = vmul.f32 %v1648_v34, %v1153_v32  ;;  %v1344_v11 = vmul.f32 %v1649_v10, %v1153_v32  ;;  %v1671_v7 = vld [vmem:[%s3232_s0 + $0x2d8] sm:$0xff]  ;;  %v1672_v45 = vld [vmem:[%s3232_s0 + $0x300] sm:$0xff]  ;;  %v1673_v9 = vld [vmem:[%s3232_s0 + $0x308] sm:$0xff] }
 0x374   :  { %v1674_v10 = vld [vmem:[%s3232_s0 + $0x2f0] sm:$0xff] }
 0x375   :  { %1465 = vst [vmem:[%s3237_s5 + $0x210] sm:$0xff] %v1337_v33  ;;  %1466 = vst [vmem:[%s3237_s5 + $0x218] sm:$0xff] %v1338_v37 }
 0x376   :  { %1471 = vst [vmem:[%s3237_s5 + $0x240] sm:$0xff] %v1343_v42  ;;  %1472 = vst [vmem:[%s3237_s5 + $0x248] sm:$0xff] %v1344_v11  ;;  %v1149_v53 = vpop.permute.xlu1 %1148  ;;  %v1161_v47 = vpop.permute.xlu0 %1160 }
 0x377   :  { %v1341_v12 = vmul.f32 %v1650_v35, %v1149_v53  ;;  %v1342_v46 = vmul.f32 %v1651_v50, %v1149_v53  ;;  %v1347_v3 = vmul.f32 %v1652_v52, %v1161_v47  ;;  %v1348_v23 = vmul.f32 %v1653_v13, %v1161_v47  ;;  %v1675_v53 = vld [vmem:[%s3232_s0 + $0x2f8] sm:$0xff]  ;;  %v1676_v35 = vld [vmem:[%s3232_s0 + $0x320] sm:$0xff]  ;;  %v1677_v50 = vld [vmem:[%s3232_s0 + $0x328] sm:$0xff] }
 0x378   :  { %v1678_v13 = vld [vmem:[%s3232_s0 + $0x310] sm:$0xff] }
 0x379   :  { %1469 = vst [vmem:[%s3237_s5 + $0x230] sm:$0xff] %v1341_v12  ;;  %1470 = vst [vmem:[%s3237_s5 + $0x238] sm:$0xff] %v1342_v46 }
 0x37a   :  { %1475 = vst [vmem:[%s3237_s5 + $0x260] sm:$0xff] %v1347_v3  ;;  %1476 = vst [vmem:[%s3237_s5 + $0x268] sm:$0xff] %v1348_v23  ;;  %v1157_v54 = vpop.permute.xlu1 %1156  ;;  %v1172_v59 = vpop.permute.xlu0 %1171 }
 0x37b   :  { %v1345_v36 = vmul.f32 %v1654_v1, %v1157_v54  ;;  %v1346_v51 = vmul.f32 %v1655_v14, %v1157_v54  ;;  %v1351_v15 = vmul.f32 %v1656_v49, %v1172_v59  ;;  %v1352_v38 = vmul.f32 %v1657_v16, %v1172_v59  ;;  %v1679_v54 = vld [vmem:[%s3232_s0 + $0x318] sm:$0xff]  ;;  %v1680_v1 = vld [vmem:[%s3232_s0 + $0x340] sm:$0xff]  ;;  %v1681_v14 = vld [vmem:[%s3232_s0 + $0x348] sm:$0xff] }
 0x37c   :  { %v1682_v16 = vld [vmem:[%s3232_s0 + $0x330] sm:$0xff] }
 0x37d   :  { %1473 = vst [vmem:[%s3237_s5 + $0x250] sm:$0xff] %v1345_v36  ;;  %1474 = vst [vmem:[%s3237_s5 + $0x258] sm:$0xff] %v1346_v51 }
 0x37e   :  { %1479 = vst [vmem:[%s3237_s5 + $0x280] sm:$0xff] %v1351_v15  ;;  %1480 = vst [vmem:[%s3237_s5 + $0x288] sm:$0xff] %v1352_v38  ;;  %v1165_v8 = vpop.permute.xlu1 %1164  ;;  %v1180_v18 = vpop.permute.xlu0 %1179 }
 0x37f   :  { %v1349_v48 = vmul.f32 %v1658_v22, %v1165_v8  ;;  %v1350_v0 = vmul.f32 %v1659_v55, %v1165_v8  ;;  %v1355_v60 = vmul.f32 %v1660_v26, %v1180_v18  ;;  %v1356_v27 = vmul.f32 %v1661_v19, %v1180_v18  ;;  %v1683_v8 = vld [vmem:[%s3232_s0 + $0x338] sm:$0xff]  ;;  %v1684_v22 = vld [vmem:[%s3232_s0 + $0x360] sm:$0xff]  ;;  %v1685_v55 = vld [vmem:[%s3232_s0 + $0x368] sm:$0xff] }
 0x380   :  { %v1686_v19 = vld [vmem:[%s3232_s0 + $0x350] sm:$0xff] }
 0x381   :  { %1477 = vst [vmem:[%s3237_s5 + $0x270] sm:$0xff] %v1349_v48  ;;  %1478 = vst [vmem:[%s3237_s5 + $0x278] sm:$0xff] %v1350_v0 }
 0x382   :  { %1483 = vst [vmem:[%s3237_s5 + $0x2a0] sm:$0xff] %v1355_v60  ;;  %1484 = vst [vmem:[%s3237_s5 + $0x2a8] sm:$0xff] %v1356_v27  ;;  %v1176_v28 = vpop.permute.xlu1 %1175  ;;  %v1188_v4 = vpop.permute.xlu0 %1187 }
 0x383   :  { %v1353_v20 = vmul.f32 %v1662_v61, %v1176_v28  ;;  %v1354_v43 = vmul.f32 %v1663_v57, %v1176_v28  ;;  %v1359_v58 = vmul.f32 %v1664_v62, %v1188_v4  ;;  %v1360_v44 = vmul.f32 %v1665_v17, %v1188_v4  ;;  %v1687_v28 = vld [vmem:[%s3232_s0 + $0x358] sm:$0xff]  ;;  %v1688_v61 = vld [vmem:[%s3232_s0 + $0x380] sm:$0xff]  ;;  %v1689_v57 = vld [vmem:[%s3232_s0 + $0x388] sm:$0xff] }
 0x384   :  { %v1690_v17 = vld [vmem:[%s3232_s0 + $0x370] sm:$0xff] }
 0x385   :  { %1481 = vst [vmem:[%s3237_s5 + $0x290] sm:$0xff] %v1353_v20  ;;  %1482 = vst [vmem:[%s3237_s5 + $0x298] sm:$0xff] %v1354_v43 }
 0x386   :  { %1487 = vst [vmem:[%s3237_s5 + $0x2c0] sm:$0xff] %v1359_v58  ;;  %1488 = vst [vmem:[%s3237_s5 + $0x2c8] sm:$0xff] %v1360_v44  ;;  %v1184_v25 = vpop.permute.xlu1 %1183  ;;  %v1196_v29 = vpop.permute.xlu0 %1195 }
 0x387   :  { %v1357_v21 = vmul.f32 %v1666_v24, %v1184_v25  ;;  %v1358_v5 = vmul.f32 %v1667_v2, %v1184_v25  ;;  %v1363_v6 = vmul.f32 %v1668_v63, %v1196_v29  ;;  %v1364_v56 = vmul.f32 %v1669_v30, %v1196_v29  ;;  %v1691_v25 = vld [vmem:[%s3232_s0 + $0x378] sm:$0xff]  ;;  %v1692_v24 = vld [vmem:[%s3232_s0 + $0x3a0] sm:$0xff]  ;;  %v1693_v2 = vld [vmem:[%s3232_s0 + $0x3a8] sm:$0xff] }
 0x388   :  { %v1694_v30 = vld [vmem:[%s3232_s0 + $0x390] sm:$0xff] }
 0x389   :  { %1485 = vst [vmem:[%s3237_s5 + $0x2b0] sm:$0xff] %v1357_v21  ;;  %1486 = vst [vmem:[%s3237_s5 + $0x2b8] sm:$0xff] %v1358_v5 }
 0x38a   :  { %1491 = vst [vmem:[%s3237_s5 + $0x2e0] sm:$0xff] %v1363_v6  ;;  %1492 = vst [vmem:[%s3237_s5 + $0x2e8] sm:$0xff] %v1364_v56  ;;  %v1192_v39 = vpop.permute.xlu1 %1191  ;;  %v1207_v31 = vpop.permute.xlu0 %1206 }
 0x38b   :  { %v1361_v41 = vmul.f32 %v1670_v40, %v1192_v39  ;;  %v1362_v32 = vmul.f32 %v1671_v7, %v1192_v39  ;;  %v1367_v33 = vmul.f32 %v1672_v45, %v1207_v31  ;;  %v1368_v37 = vmul.f32 %v1673_v9, %v1207_v31  ;;  %v1695_v39 = vld [vmem:[%s3232_s0 + $0x398] sm:$0xff]  ;;  %v1696_v40 = vld [vmem:[%s3232_s0 + $0x3c0] sm:$0xff]  ;;  %v1697_v7 = vld [vmem:[%s3232_s0 + $0x3c8] sm:$0xff] }
 0x38c   :  { %v1698_v9 = vld [vmem:[%s3232_s0 + $0x3b0] sm:$0xff] }
 0x38d   :  { %1489 = vst [vmem:[%s3237_s5 + $0x2d0] sm:$0xff] %v1361_v41  ;;  %1490 = vst [vmem:[%s3237_s5 + $0x2d8] sm:$0xff] %v1362_v32 }
 0x38e   :  { %1495 = vst [vmem:[%s3237_s5 + $0x300] sm:$0xff] %v1367_v33  ;;  %1496 = vst [vmem:[%s3237_s5 + $0x308] sm:$0xff] %v1368_v37  ;;  %v1200_v34 = vpop.permute.xlu1 %1199  ;;  %v1215_v42 = vpop.permute.xlu0 %1214 }
 0x38f   :  { %v1365_v11 = vmul.f32 %v1674_v10, %v1200_v34  ;;  %v1366_v47 = vmul.f32 %v1675_v53, %v1200_v34  ;;  %v1371_v12 = vmul.f32 %v1676_v35, %v1215_v42  ;;  %v1372_v46 = vmul.f32 %v1677_v50, %v1215_v42  ;;  %v1699_v34 = vld [vmem:[%s3232_s0 + $0x3b8] sm:$0xff]  ;;  %v1700_v10 = vld [vmem:[%s3232_s0 + $0x3e0] sm:$0xff]  ;;  %v1701_v53 = vld [vmem:[%s3232_s0 + $0x3e8] sm:$0xff] }
 0x391   :  { %1493 = vst [vmem:[%s3237_s5 + $0x2f0] sm:$0xff] %v1365_v11  ;;  %1494 = vst [vmem:[%s3237_s5 + $0x2f8] sm:$0xff] %v1366_v47 }
 0x392   :  { %1499 = vst [vmem:[%s3237_s5 + $0x320] sm:$0xff] %v1371_v12  ;;  %1500 = vst [vmem:[%s3237_s5 + $0x328] sm:$0xff] %v1372_v46  ;;  %v1211_v52 = vpop.permute.xlu1 %1210  ;;  %v1223_v3 = vpop.permute.xlu0 %1222  ;;  %v1702_v12 = vld [vmem:[%s3232_s0 + $0x3d0] sm:$0xff]  ;;  %v1703_v46 = vld [vmem:[%s3232_s0 + $0x3d8] sm:$0xff] }
 0x393   :  { %v1369_v23 = vmul.f32 %v1678_v13, %v1211_v52  ;;  %v1370_v59 = vmul.f32 %v1679_v54, %v1211_v52  ;;  %v1375_v36 = vmul.f32 %v1680_v1, %v1223_v3  ;;  %v1376_v51 = vmul.f32 %v1681_v14, %v1223_v3  ;;  %v1704_v13 = vld [vmem:[%s3232_s0 + $0x3f0] sm:$0xff]  ;;  %v1705_v54 = vld [vmem:[%s3232_s0 + $0x3f8] sm:$0xff] }
 0x395   :  { %1497 = vst [vmem:[%s3237_s5 + $0x310] sm:$0xff] %v1369_v23  ;;  %1498 = vst [vmem:[%s3237_s5 + $0x318] sm:$0xff] %v1370_v59 }
 0x396   :  { %1503 = vst [vmem:[%s3237_s5 + $0x340] sm:$0xff] %v1375_v36  ;;  %1504 = vst [vmem:[%s3237_s5 + $0x348] sm:$0xff] %v1376_v51  ;;  %v1219_v49 = vpop.permute.xlu1 %1218  ;;  %v1231_v15 = vpop.permute.xlu0 %1230 }
 0x397   :  { %v1373_v38 = vmul.f32 %v1682_v16, %v1219_v49  ;;  %v1374_v18 = vmul.f32 %v1683_v8, %v1219_v49  ;;  %v1379_v48 = vmul.f32 %v1684_v22, %v1231_v15  ;;  %v1380_v0 = vmul.f32 %v1685_v55, %v1231_v15 }
 0x399   :  { %1501 = vst [vmem:[%s3237_s5 + $0x330] sm:$0xff] %v1373_v38  ;;  %1502 = vst [vmem:[%s3237_s5 + $0x338] sm:$0xff] %v1374_v18 }
 0x39a   :  { %1507 = vst [vmem:[%s3237_s5 + $0x360] sm:$0xff] %v1379_v48  ;;  %1508 = vst [vmem:[%s3237_s5 + $0x368] sm:$0xff] %v1380_v0  ;;  %v1227_v26 = vpop.permute.xlu1 %1226  ;;  %v1242_v60 = vpop.permute.xlu0 %1241 }
 0x39b   :  { %v1377_v27 = vmul.f32 %v1686_v19, %v1227_v26  ;;  %v1378_v4 = vmul.f32 %v1687_v28, %v1227_v26  ;;  %v1383_v20 = vmul.f32 %v1688_v61, %v1242_v60  ;;  %v1384_v43 = vmul.f32 %v1689_v57, %v1242_v60 }
 0x39d   :  { %1505 = vst [vmem:[%s3237_s5 + $0x350] sm:$0xff] %v1377_v27  ;;  %1506 = vst [vmem:[%s3237_s5 + $0x358] sm:$0xff] %v1378_v4 }
 0x39e   :  { %1511 = vst [vmem:[%s3237_s5 + $0x380] sm:$0xff] %v1383_v20  ;;  %1512 = vst [vmem:[%s3237_s5 + $0x388] sm:$0xff] %v1384_v43  ;;  %v1235_v62 = vpop.permute.xlu1 %1234  ;;  %v1250_v58 = vpop.permute.xlu0 %1249 }
 0x39f   :  { %v1381_v44 = vmul.f32 %v1690_v17, %v1235_v62  ;;  %v1382_v29 = vmul.f32 %v1691_v25, %v1235_v62  ;;  %v1387_v21 = vmul.f32 %v1692_v24, %v1250_v58  ;;  %v1388_v5 = vmul.f32 %v1693_v2, %v1250_v58 }
 0x3a1   :  { %1509 = vst [vmem:[%s3237_s5 + $0x370] sm:$0xff] %v1381_v44  ;;  %1510 = vst [vmem:[%s3237_s5 + $0x378] sm:$0xff] %v1382_v29 }
 0x3a2   :  { %1515 = vst [vmem:[%s3237_s5 + $0x3a0] sm:$0xff] %v1387_v21  ;;  %1516 = vst [vmem:[%s3237_s5 + $0x3a8] sm:$0xff] %v1388_v5  ;;  %v1246_v63 = vpop.permute.xlu1 %1245  ;;  %v1258_v6 = vpop.permute.xlu0 %1257 }
 0x3a3   :  { %v1385_v56 = vmul.f32 %v1694_v30, %v1246_v63  ;;  %v1386_v31 = vmul.f32 %v1695_v39, %v1246_v63  ;;  %v1391_v41 = vmul.f32 %v1696_v40, %v1258_v6  ;;  %v1392_v32 = vmul.f32 %v1697_v7, %v1258_v6 }
 0x3a5   :  { %1513 = vst [vmem:[%s3237_s5 + $0x390] sm:$0xff] %v1385_v56  ;;  %1514 = vst [vmem:[%s3237_s5 + $0x398] sm:$0xff] %v1386_v31 }
 0x3a6   :  { %1519 = vst [vmem:[%s3237_s5 + $0x3c0] sm:$0xff] %v1391_v41  ;;  %1520 = vst [vmem:[%s3237_s5 + $0x3c8] sm:$0xff] %v1392_v32  ;;  %v1254_v45 = vpop.permute.xlu1 %1253  ;;  %v1266_v33 = vpop.permute.xlu0 %1265 }
 0x3a7   :  { %v1389_v37 = vmul.f32 %v1698_v9, %v1254_v45  ;;  %v1390_v42 = vmul.f32 %v1699_v34, %v1254_v45  ;;  %v1395_v11 = vmul.f32 %v1700_v10, %v1266_v33  ;;  %v1396_v47 = vmul.f32 %v1701_v53, %v1266_v33 }
 0x3a9   :  { %1517 = vst [vmem:[%s3237_s5 + $0x3b0] sm:$0xff] %v1389_v37  ;;  %1518 = vst [vmem:[%s3237_s5 + $0x3b8] sm:$0xff] %v1390_v42 }
 0x3aa   :  { %1523 = vst [vmem:[%s3237_s5 + $0x3e0] sm:$0xff] %v1395_v11  ;;  %1524 = vst [vmem:[%s3237_s5 + $0x3e8] sm:$0xff] %v1396_v47  ;;  %v1262_v35 = vpop.permute.xlu1 %1261 }
 0x3ab   :  { %v1393_v50 = vmul.f32 %v1702_v12, %v1262_v35  ;;  %v1394_v52 = vmul.f32 %v1703_v46, %v1262_v35 }
 0x3ad   :  { %1521 = vst [vmem:[%s3237_s5 + $0x3d0] sm:$0xff] %v1393_v50  ;;  %1522 = vst [vmem:[%s3237_s5 + $0x3d8] sm:$0xff] %v1394_v52 }
 0x3ae   :  { %v1270_v3 = vpop.permute.xlu1 %1269 }
 0x3af   :  { %v1397_v23 = vmul.f32 %v1704_v13, %v1270_v3  ;;  %v1398_v59 = vmul.f32 %v1705_v54, %v1270_v3 }
 0x3b1   :  { %1525 = vst [vmem:[%s3237_s5 + $0x3f0] sm:$0xff] %v1397_v23  ;;  %1526 = vst [vmem:[%s3237_s5 + $0x3f8] sm:$0xff] %v1398_v59 }

</bundles_post_ra>
